<compile_context>
chip_gen: v7x
topology: tpu7x:2x2x1
jax: 0.10.0
libtpu: 0.0.40
codegen_flags: <defaults>
</compile_context>

<pallas_src>
import functools

import jax
import jax.numpy as jnp
from jax.experimental import pallas as pl
from jax.experimental.pallas import tpu as pltpu


# -----------------------------------------------------------------------------
# Kernels
# -----------------------------------------------------------------------------
def _cc_projection_kernel(c_ref, t_ref, wc_ref, wt_ref, b_ref, o_ref):
    # c: (B, 768)  wc: (768, 768)  -> MXU dot, lane-aligned K=768
    acc = jnp.dot(c_ref[...], wc_ref[...], preferred_element_type=jnp.float32)
    # camera T contribution: (B, 4) x (4, 768) as 4 broadcast FMAs on the VPU
    t = t_ref[...]                       # (B, 4)
    wt = wt_ref[...]                     # (4, 768)
    for k in range(4):                   # static unroll
        acc = acc + t[:, k:k + 1] * wt[k:k + 1, :]
    o_ref[...] = acc + b_ref[...]


def _cfg_kernel(uncond_ref, cond_ref, o_ref, *, scale):
    # scale is a static Python float closed over the kernel
    u = uncond_ref[...]
    o_ref[...] = u + scale * (cond_ref[...] - u)


def _decode_post_kernel(x_ref, o_ref):
    o_ref[...] = jnp.clip(x_ref[...] * 0.5 + 0.5, 0.0, 1.0).astype(o_ref.dtype)


# -----------------------------------------------------------------------------
# Tiling helpers
# -----------------------------------------------------------------------------
def _pick_lane_chunk(F, target=32768):
    """Largest multiple-of-128 divisor of F that is <= target (else full F)."""
    if F <= target or F % 128 != 0:
        return F
    c = target - (target % 128)
    while c >= 128:
        if F % c == 0:
            return c
        c -= 128
    return F


def _elementwise_params(total_block_bytes):
    # double-buffered in+out blocks plus headroom; explicit so v7x (64 MiB VMEM,
    # 32 MiB scoped default) never relies on whole-array residency.
    limit = int(max(4 * total_block_bytes, 4 * 1024 * 1024))
    return pltpu.CompilerParams(dimension_semantics=("parallel",),
                                vmem_limit_bytes=limit)


# -----------------------------------------------------------------------------
# Wrappers (plain-JAX glue + pallas_call)
# -----------------------------------------------------------------------------
def make_T(theta, azimuth, distance, in_deg=False):
    """Camera embedding used by zero123: [theta, sin(az), cos(az), distance] -> (B, 4)."""
    if in_deg:
        theta = jnp.deg2rad(theta)
        azimuth = jnp.deg2rad(azimuth)
    return jnp.stack(
        [theta, jnp.sin(azimuth), jnp.cos(azimuth), distance], axis=-1
    ).astype(jnp.float32)


def prepare_cc_projection_params(cc_w, cc_b):
    """One-time weight prep. cc_w: (768, 772) torch nn.Linear layout, cc_b: (768,).

    Returns (w_clip (768,768), w_cam (4,768), bias (1,768)); the transpose/split
    happens once here instead of per clip_camera_projection call.
    """
    w_t = jnp.asarray(cc_w, jnp.float32).T            # (772, 768)
    w_clip = w_t[:768, :]                              # CLIP-embedding part
    w_cam = w_t[768:, :]                               # camera-T part
    b2d = jnp.asarray(cc_b, jnp.float32).reshape(1, -1)
    return w_clip, w_cam, b2d


def clip_camera_projection(theta, azimuth, distance, c_crossattn, cc_params,
                           in_deg=False):
    """Mirrors Zero123.clip_camera_projection.

    theta/azimuth/distance: (B,)   c_crossattn: (B, 1, 768)
    cc_params: output of prepare_cc_projection_params
    returns (B, 1, 768)

    Note: with M=B this GEMM is launch-overhead dominated; the kernel exists for
    fusion of concat-free projection, not for MXU throughput.
    """
    w_clip, w_cam, b2d = cc_params
    T = make_T(theta, azimuth, distance, in_deg=in_deg)   # (B, 4)
    c = c_crossattn[:, 0, :]                              # (B, 768)
    B = c.shape[0]
    Fout = w_clip.shape[1]
    y = pl.pallas_call(
        _cc_projection_kernel,
        out_shape=jax.ShapeDtypeStruct((B, Fout), jnp.float32),
        in_specs=[
            pl.BlockSpec((B, 768), lambda: (0, 0)),
            pl.BlockSpec((B, 4), lambda: (0, 0)),
            pl.BlockSpec((768, Fout), lambda: (0, 0)),
            pl.BlockSpec((4, Fout), lambda: (0, 0)),
            pl.BlockSpec((1, Fout), lambda: (0, 0)),
        ],
        out_specs=pl.BlockSpec((B, Fout), lambda: (0, 0)),
    )(c, T, w_clip, w_cam, b2d)
    return y[:, None, :]


def cfg_combine(noise_pred, scale, lane_chunk_target=32768):
    """noise_pred: (2B, C, H, W) NCHW; first B = uncond, last B = cond.

    Returns uncond + scale * (cond - uncond) with shape (B, C, H, W).
    Lane/sublane-dense layout (B*C, H*W); gridded + parallel over lane chunks.
    """
    two_b, C, H, W = noise_pred.shape
    B = two_b // 2
    R = B * C
    F = H * W
    uncond = noise_pred[:B].reshape(R, F)
    cond = noise_pred[B:].reshape(R, F)
    chunk = _pick_lane_chunk(F, lane_chunk_target)
    grid = (F // chunk,)
    itemsize = noise_pred.dtype.itemsize
    out = pl.pallas_call(
        functools.partial(_cfg_kernel, scale=float(scale)),
        out_shape=jax.ShapeDtypeStruct((R, F), noise_pred.dtype),
        grid=grid,
        in_specs=[
            pl.BlockSpec((R, chunk), lambda i: (0, i)),
            pl.BlockSpec((R, chunk), lambda i: (0, i)),
        ],
        out_specs=pl.BlockSpec((R, chunk), lambda i: (0, i)),
        compiler_params=_elementwise_params(3 * R * chunk * itemsize),
    )(uncond, cond)
    return out.reshape(B, C, H, W)


def decode_postprocess(image, out_dtype=None, lane_chunk_target=32768):
    """image: (B, 3, H, W) NCHW; returns (image*0.5 + 0.5).clamp(0, 1).

    out_dtype lets bandwidth-starved targets (v5e) emit bf16 / the final image
    dtype directly from the kernel, halving HBM writeback. Default preserves
    the input dtype (module semantics: .to(input_dtype)).
    """
    B, C, H, W = image.shape
    out_dtype = image.dtype if out_dtype is None else jnp.dtype(out_dtype)
    R = B * C
    F = H * W
    flat = image.reshape(R, F)
    chunk = _pick_lane_chunk(F, lane_chunk_target)
    grid = (F // chunk,)
    block_bytes = R * chunk * (image.dtype.itemsize + jnp.dtype(out_dtype).itemsize)
    out = pl.pallas_call(
        _decode_post_kernel,
        out_shape=jax.ShapeDtypeStruct((R, F), out_dtype),
        grid=grid,
        in_specs=[pl.BlockSpec((R, chunk), lambda i: (0, i))],
        out_specs=pl.BlockSpec((R, chunk), lambda i: (0, i)),
        compiler_params=_elementwise_params(block_bytes),
    )(flat)
    return out.reshape(B, C, H, W)


# -----------------------------------------------------------------------------
# Reference implementations (plain JAX) for correctness checking
# -----------------------------------------------------------------------------
def _ref_clip_camera_projection(theta, azimuth, distance, c_crossattn, cc_w, cc_b,
                                in_deg=False):
    T = make_T(theta, azimuth, distance, in_deg=in_deg)
    x = jnp.concatenate([c_crossattn[:, 0, :], T], axis=-1)
    return (x @ cc_w.T + cc_b)[:, None, :]


def _ref_cfg(noise_pred, scale):
    B = noise_pred.shape[0] // 2
    u, c = noise_pred[:B], noise_pred[B:]
    return u + scale * (c - u)


def _ref_post(image):
    return jnp.clip(image * 0.5 + 0.5, 0.0, 1.0)


# -----------------------------------------------------------------------------
if __name__ == "__main__":
    key = jax.random.PRNGKey(0)
    kz = jax.random.split(key, 8)

    B = 2
    H = W = 32  # small spatial size for the demo (real model: 32 latent / 512 image)

    # Camera parameters (degrees) and CLIP image embedding.
    theta = jax.random.uniform(kz[0], (B,), jnp.float32, -90.0, 90.0)
    azimuth = jax.random.uniform(kz[1], (B,), jnp.float32, -180.0, 180.0)
    distance = jax.random.uniform(kz[2], (B,), jnp.float32, -0.5, 0.5)
    c_crossattn = jax.random.normal(kz[3], (B, 1, 768), jnp.float32)

    # cc_projection = nn.Linear(772, 768): deterministic synthetic weights.
    cc_w = jax.random.normal(kz[4], (768, 772), jnp.float32) * 0.02
    cc_b = jax.random.normal(kz[5], (768,), jnp.float32) * 0.02
    cc_params = prepare_cc_projection_params(cc_w, cc_b)   # transpose/split once

    # Synthetic UNet output (stands in for model.apply_model) and decoded image.
    noise_pred = jax.random.normal(kz[6], (2 * B, 4, H, W), jnp.float32)
    decoded = jax.random.normal(kz[7], (B, 3, H, W), jnp.float32)
    guidance_scale = 3.0

    # --- run Pallas kernels ---
    clip_emb = clip_camera_projection(theta, azimuth, distance, c_crossattn,
                                      cc_params, in_deg=True)
    guided = cfg_combine(noise_pred, guidance_scale)
    images = decode_postprocess(decoded)
    images_bf16 = decode_postprocess(decoded, out_dtype=jnp.bfloat16)
    jax.block_until_ready((clip_emb, guided, images, images_bf16))

    # --- check against plain-JAX references ---
    ref_emb = _ref_clip_camera_projection(theta, azimuth, distance, c_crossattn,
                                          cc_w, cc_b, in_deg=True)
    ref_guided = _ref_cfg(noise_pred, guidance_scale)
    ref_images = _ref_post(decoded)

    assert clip_emb.shape == (B, 1, 768)
    assert guided.shape == (B, 4, H, W)
    assert images.shape == (B, 3, H, W)
    assert images_bf16.dtype == jnp.bfloat16
    assert jnp.allclose(clip_emb, ref_emb, atol=1e-4, rtol=1e-4)
    assert jnp.allclose(guided, ref_guided, atol=1e-5, rtol=1e-5)
    assert jnp.allclose(images, ref_images, atol=1e-6, rtol=1e-6)
    assert jnp.allclose(images_bf16.astype(jnp.float32), ref_images,
                        atol=1e-2, rtol=1e-2)

    print("KERNEL_OK")
</pallas_src>

<mosaic_0001>
module attributes {stable_mosaic.version = 11 : i64} {
  func.func @_cc_projection_kernel(%arg0: memref<2x768xf32, #tpu.memory_space<vmem>>, %arg1: memref<2x4xf32, #tpu.memory_space<vmem>>, %arg2: memref<768x768xf32, #tpu.memory_space<vmem>>, %arg3: memref<4x768xf32, #tpu.memory_space<vmem>>, %arg4: memref<1x768xf32, #tpu.memory_space<vmem>>, %arg5: memref<2x768xf32, #tpu.memory_space<vmem>>) attributes {dimension_semantics = [], scalar_prefetch = 0 : i64, scratch_operands = 0 : i64, tpu.core_type = #tpu.core_type<tc>} {
    %c0 = arith.constant 0 : index
    %c0_0 = arith.constant 0 : index
    %0 = vector.load %arg0[%c0, %c0_0] : memref<2x768xf32, #tpu.memory_space<vmem>>, vector<2x768xf32>
    %c0_1 = arith.constant 0 : index
    %c0_2 = arith.constant 0 : index
    %1 = vector.load %arg2[%c0_1, %c0_2] : memref<768x768xf32, #tpu.memory_space<vmem>>, vector<768x768xf32>
    %cst = arith.constant dense<0.000000e+00> : vector<2x768xf32>
    %2 = tpu.matmul %0, %1, %cst {dimension_numbers = #tpu.dot_dimension_numbers<[1], [0], [0], [1], [0, 0, 1, 1], [], []>} : vector<2x768xf32>, vector<768x768xf32>, vector<2x768xf32> -> vector<2x768xf32>
    %c0_3 = arith.constant 0 : index
    %c0_4 = arith.constant 0 : index
    %3 = vector.load %arg1[%c0_3, %c0_4] : memref<2x4xf32, #tpu.memory_space<vmem>>, vector<2x4xf32>
    %c0_5 = arith.constant 0 : index
    %c0_6 = arith.constant 0 : index
    %4 = vector.load %arg3[%c0_5, %c0_6] : memref<4x768xf32, #tpu.memory_space<vmem>>, vector<4x768xf32>
    %5 = vector.extract_strided_slice %3 {offsets = [0, 0], sizes = [2, 1], strides = [1, 1]} : vector<2x4xf32> to vector<2x1xf32>
    %6 = vector.extract_strided_slice %4 {offsets = [0, 0], sizes = [1, 768], strides = [1, 1]} : vector<4x768xf32> to vector<1x768xf32>
    %7 = vector.broadcast %5 : vector<2x1xf32> to vector<2x768xf32>
    %8 = vector.broadcast %6 : vector<1x768xf32> to vector<2x768xf32>
    %9 = arith.mulf %7, %8 : vector<2x768xf32>
    %10 = arith.addf %2, %9 : vector<2x768xf32>
    %11 = vector.extract_strided_slice %3 {offsets = [0, 1], sizes = [2, 1], strides = [1, 1]} : vector<2x4xf32> to vector<2x1xf32>
    %12 = vector.extract_strided_slice %4 {offsets = [1, 0], sizes = [1, 768], strides = [1, 1]} : vector<4x768xf32> to vector<1x768xf32>
    %13 = vector.broadcast %11 : vector<2x1xf32> to vector<2x768xf32>
    %14 = vector.broadcast %12 : vector<1x768xf32> to vector<2x768xf32>
    %15 = arith.mulf %13, %14 : vector<2x768xf32>
    %16 = arith.addf %10, %15 : vector<2x768xf32>
    %17 = vector.extract_strided_slice %3 {offsets = [0, 2], sizes = [2, 1], strides = [1, 1]} : vector<2x4xf32> to vector<2x1xf32>
    %18 = vector.extract_strided_slice %4 {offsets = [2, 0], sizes = [1, 768], strides = [1, 1]} : vector<4x768xf32> to vector<1x768xf32>
    %19 = vector.broadcast %17 : vector<2x1xf32> to vector<2x768xf32>
    %20 = vector.broadcast %18 : vector<1x768xf32> to vector<2x768xf32>
    %21 = arith.mulf %19, %20 : vector<2x768xf32>
    %22 = arith.addf %16, %21 : vector<2x768xf32>
    %23 = vector.extract_strided_slice %3 {offsets = [0, 3], sizes = [2, 1], strides = [1, 1]} : vector<2x4xf32> to vector<2x1xf32>
    %24 = vector.extract_strided_slice %4 {offsets = [3, 0], sizes = [1, 768], strides = [1, 1]} : vector<4x768xf32> to vector<1x768xf32>
    %25 = vector.broadcast %23 : vector<2x1xf32> to vector<2x768xf32>
    %26 = vector.broadcast %24 : vector<1x768xf32> to vector<2x768xf32>
    %27 = arith.mulf %25, %26 : vector<2x768xf32>
    %28 = arith.addf %22, %27 : vector<2x768xf32>
    %c0_7 = arith.constant 0 : index
    %c0_8 = arith.constant 0 : index
    %29 = vector.load %arg4[%c0_7, %c0_8] : memref<1x768xf32, #tpu.memory_space<vmem>>, vector<1x768xf32>
    %30 = vector.broadcast %29 : vector<1x768xf32> to vector<2x768xf32>
    %31 = arith.addf %28, %30 : vector<2x768xf32>
    %c0_9 = arith.constant 0 : index
    %c0_10 = arith.constant 0 : index
    %32 = vector.load %arg5[%c0_9, %c0_10] : memref<2x768xf32, #tpu.memory_space<vmem>>, vector<2x768xf32>
    tpu.vector_store %arg5[%c0_9, %c0_10], %31 {strides = array<i32>} : memref<2x768xf32, #tpu.memory_space<vmem>>, vector<2x768xf32>,
    return
  }
}

</mosaic_0001>

<bundles_post_ra>
// kernel: tpu_custom_call.1
= control target key start
LH: loop header
LB: loop body
LE: loop exit
PB: predicated region body
PF: predicated region fallthrough
CT: control target
= control target key end

     0   :  { %10 = vsyncpa [#allocation3], 0  ;;  %s2752_s0 = inlined_call_operand.hbm [shape: f32[2,768], index: 0, kind: input, shape index: {}]   ;;  %s2753_s1 = inlined_call_operand.hbm [shape: f32[2,4], index: 1, kind: input, shape index: {}]   ;;  %s2754_s2 = inlined_call_operand.hbm [shape: f32[768,768], index: 2, kind: input, shape index: {}]   ;;  %s2755_s3 = inlined_call_operand.hbm [shape: f32[4,768], index: 3, kind: input, shape index: {}]   ;;  %s2756_s4 = inlined_call_operand.hbm [shape: f32[1,768], index: 4, kind: input, shape index: {}]   ;;  %s2757_s5 = inlined_call_operand.hbm [shape: f32[2,768], index: 5, kind: output, shape index: {}]  }
   0x1   :  { %11 = vsyncpa [#allocation6], 0 }
   0x2   :  { %12 = vsyncpa [#allocation9], 0 }
   0x3   :  { %13 = vsyncpa [#allocation4], 0  ;;  %s2459_s18 = smov [#allocation5]   ;;  %s2460_s20 = smov [#allocation8]  }
   0x4   :  { %s30_s19 = sshll.u32 %s2459_s18, 4  ;;  %s52_s21 = sshll.u32 %s2460_s20, 4  ;;  %s31_s19 = int_to_ptr.vmem [resolvable:$true] %s30_s19  ;;  %s53_s21 = int_to_ptr.vmem [resolvable:$true] %s52_s21 }
   0x5   :  { %s2319_s24 = scalar_lea.hbm %s2753_s1, 32 }
   0x6   :  { %p2320_p0 = scmp.ne.s32.totalorder %s2753_s1, %s2319_s24  ;;  %p2323_p1 = scmp.lt.u32.totalorder %s2319_s24, %s2753_s1 }
   0x8   :  { %p2325_p2 = pnand %p2323_p1, %p2320_p0 }
   0xa   :  { %2328 = shalt.err (!%p2325_p2)
}
   0xb   :  { %s2329_s29 = scalar_lea.vmem %s31_s19, 32  ;;  %p2334_p4 = scmp.lt.s32.totalorder %s31_s19, %s31_s19 }
   0xc   :  { %p2330_p3 = scmp.ne.s32.totalorder %s31_s19, %s2329_s29  ;;  %p2335_p5 = scmp.lt.s32.totalorder %s2329_s29, %s2329_s29 }
   0xe   :  { %p2336_p6 = por %p2335_p5, %p2334_p4 }
  0x10   :  { %p2337_p7 = pnand %p2336_p6, %p2330_p3 }
  0x12   :  { %2340 = shalt.err (!%p2337_p7)
}
  0x13   :  { %33 = dma.hbm_to_vmem [thread:$0]  %s2753_s1, 32, %s31_s19, [#allocation6]  }
  0x14   :  { %s2341_s9 = scalar_lea.hbm %s2755_s3, 384 }
  0x15   :  { %p2342_p8 = scmp.ne.s32.totalorder %s2755_s3, %s2341_s9  ;;  %p2345_p9 = scmp.lt.u32.totalorder %s2341_s9, %s2755_s3 }
  0x17   :  { %p2347_p10 = pnand %p2345_p9, %p2342_p8 }
  0x19   :  { %2350 = shalt.err (!%p2347_p10)
}
  0x1a   :  { %s2351_s14 = scalar_lea.vmem %s53_s21, 384  ;;  %p2356_p12 = scmp.lt.s32.totalorder %s53_s21, %s53_s21 }
  0x1b   :  { %p2352_p11 = scmp.ne.s32.totalorder %s53_s21, %s2351_s14  ;;  %p2357_p13 = scmp.lt.s32.totalorder %s2351_s14, %s2351_s14 }
  0x1d   :  { %p2358_p0 = por %p2357_p13, %p2356_p12 }
  0x1f   :  { %p2359_p1 = pnand %p2358_p0, %p2352_p11 }
  0x21   :  { %2362 = shalt.err (!%p2359_p1)
}
  0x22   :  { %55 = dma.hbm_to_vmem [thread:$0]  %s2755_s3, 384, %s53_s21, [#allocation9]  }
  0x23   :  { %s2461_s16 = smov [#allocation2]   ;;  %s2462_s18 = smov [#allocation7]  }
  0x24   :  { %s20_s17 = sshll.u32 %s2461_s16, 4  ;;  %s39_s19 = sshll.u32 %s2462_s18, 4  ;;  %s21_s17 = int_to_ptr.vmem [resolvable:$true] %s20_s17  ;;  %s2526_s19 = int_to_ptr.vmem [resolvable:$true] %s39_s19 }
  0x25   :  { %s2363_s23 = scalar_lea.hbm %s2752_s0, 192 }
  0x26   :  { %p2364_p2 = scmp.ne.s32.totalorder %s2752_s0, %s2363_s23  ;;  %p2367_p3 = scmp.lt.u32.totalorder %s2363_s23, %s2752_s0 }
  0x28   :  { %p2369_p4 = pnand %p2367_p3, %p2364_p2 }
  0x2a   :  { %2372 = shalt.err (!%p2369_p4)
}
  0x2b   :  { %s2373_s3 = scalar_lea.vmem %s21_s17, 192  ;;  %p2378_p6 = scmp.lt.s32.totalorder %s21_s17, %s21_s17 }
  0x2c   :  { %p2374_p5 = scmp.ne.s32.totalorder %s21_s17, %s2373_s3  ;;  %p2379_p7 = scmp.lt.s32.totalorder %s2373_s3, %s2373_s3 }
  0x2e   :  { %p2380_p8 = por %p2379_p7, %p2378_p6 }
  0x30   :  { %p2381_p9 = pnand %p2380_p8, %p2374_p5 }
  0x32   :  { %2384 = shalt.err (!%p2381_p9)
}
  0x33   :  { %23 = dma.hbm_to_vmem [thread:$0]  %s2752_s0, 192, %s21_s17, [#allocation3]  }
  0x34   :  { %s2385_s6 = scalar_lea.hbm %s2754_s2, 73728 }
  0x35   :  { %p2386_p10 = scmp.ne.s32.totalorder %s2754_s2, %s2385_s6  ;;  %p2389_p11 = scmp.lt.u32.totalorder %s2385_s6, %s2754_s2 }
  0x37   :  { %p2391_p12 = pnand %p2389_p11, %p2386_p10 }
  0x39   :  { %2394 = shalt.err (!%p2391_p12)
}
  0x3a   :  { %s2395_s11 = scalar_lea.vmem %s2526_s19, 73728  ;;  %p2400_p0 = scmp.lt.s32.totalorder %s2526_s19, %s2526_s19 }
  0x3b   :  { %p2396_p13 = scmp.ne.s32.totalorder %s2526_s19, %s2395_s11  ;;  %p2401_p1 = scmp.lt.s32.totalorder %s2395_s11, %s2395_s11 }
  0x3d   :  { %p2402_p2 = por %p2401_p1, %p2400_p0 }
  0x3f   :  { %p2403_p3 = pnand %p2402_p2, %p2396_p13 }
  0x41   :  { %2406 = shalt.err (!%p2403_p3)
}
  0x42   :  { %s2463_s0 = smov 768   ;;  %s2464_s12 = smov 48  }
  0x43   :  { %45 = dma.hbm_to_vmem [thread:$0]  %s2754_s2, 73728, %s2526_s19, [#allocation6], %s2463_s0, %s2463_s0, %s2464_s12  }
  0x44   :  { %s2465_s1 = smov [#allocation10]   ;;  %s2407_s18 = scalar_lea.hbm %s2756_s4, 96 }
  0x45   :  { %s62_s15 = sshll.u32 %s2465_s1, 4  ;;  %p2408_p4 = scmp.ne.s32.totalorder %s2756_s4, %s2407_s18  ;;  %s63_s15 = int_to_ptr.vmem [resolvable:$true] %s62_s15 }
  0x46   :  { %p2411_p5 = scmp.lt.u32.totalorder %s2407_s18, %s2756_s4 }
  0x48   :  { %p2413_p6 = pnand %p2411_p5, %p2408_p4 }
  0x4a   :  { %2416 = shalt.err (!%p2413_p6)
}
  0x4b   :  { %s2417_s25 = scalar_lea.vmem %s63_s15, 96  ;;  %p2422_p8 = scmp.lt.s32.totalorder %s63_s15, %s63_s15 }
  0x4c   :  { %p2418_p7 = scmp.ne.s32.totalorder %s63_s15, %s2417_s25  ;;  %p2423_p9 = scmp.lt.s32.totalorder %s2417_s25, %s2417_s25 }
  0x4e   :  { %p2424_p10 = por %p2423_p9, %p2422_p8 }
  0x50   :  { %p2425_p11 = pnand %p2424_p10, %p2418_p7 }
  0x52   :  { %2428 = shalt.err (!%p2425_p11)
}
  0x53   :  { %65 = dma.hbm_to_vmem [thread:$0]  %s2756_s4, 96, %s63_s15, [#allocation9]  }
  0x54   :  { %2451 = dma.done.wait [#allocation3], 192  }
  0x55   :  { %2452 = vsyncadd [#allocation3], 4294967104 }
  0x56   :  { %2453 = dma.done.wait [#allocation6], 73760  }
  0x57   :  { %2454 = vsyncadd [#allocation6], 4294893536 }
  0x58   :  { %2455 = dma.done.wait [#allocation9], 480  }
  0x59   :  { %2456 = vsyncadd [#allocation9], 4294966816  ;;  %v84_v0 = vld [vmem:[#allocation7 + $0x8] sm:$0xff]  ;;  %v90_v1 = vld [vmem:[#allocation7 + $0x38] sm:$0xff]  ;;  %s2471_s4 = smov [#allocation11]  }
  0x5a   :  { %v276_v2 = vld [vmem:[#allocation7 + $0x608] sm:$0xff]  ;;  %v1705_v3 = vpack.c.bf16 %v90_v1, %v84_v0  ;;  %v282_v4 = vld [vmem:[#allocation7 + $0x638] sm:$0xff]  ;;  %v83_v5 = vld [vmem:[#allocation7] sm:$0xff]  ;;  %s1692_s26 = sshll.u32 %s2471_s4, 4  ;;  %s1693_s26 = int_to_ptr.vmem [resolvable:$true] %s1692_s26 }
  0x5b   :  { %v89_v6 = vld [vmem:[#allocation7 + $0x30] sm:$0xff]  ;;  %v1769_v7 = vpack.c.bf16 %v282_v4, %v276_v2  ;;  %v275_v9 = vld [vmem:[#allocation7 + $0x600] sm:$0xff]  ;;  %v96_v11 = vld [vmem:[#allocation7 + $0x68] sm:$0xff]  ;;  %s2429_s27 = scalar_lea.vmem %s1693_s26, 192  ;;  %p2434_p13 = scmp.lt.s32.totalorder %s1693_s26, %s1693_s26 }
  0x5c   :  { %v1707_v8 = vpack.c.bf16 %v89_v6, %v83_v5  ;;  %v281_v10 = vld [vmem:[#allocation7 + $0x630] sm:$0xff]  ;;  %1706 = vmatprep.subr.bf16.mxu1 %v1705_v3  ;;  %v102_v13 = vld [vmem:[#allocation7 + $0x98] sm:$0xff]  ;;  %v288_v14 = vld [vmem:[#allocation7 + $0x668] sm:$0xff]  ;;  %p2430_p12 = scmp.ne.s32.totalorder %s1693_s26, %s2429_s27  ;;  %p2435_p0 = scmp.lt.s32.totalorder %s2429_s27, %s2429_s27 }
  0x5d   :  { %v1771_v12 = vpack.c.bf16 %v281_v10, %v275_v9  ;;  %v294_v15 = vld [vmem:[#allocation7 + $0x698] sm:$0xff]  ;;  %1770 = vmatprep.subr.bf16.mxu0 %v1769_v7  ;;  %v1709_v16 = vpack.c.bf16 %v102_v13, %v96_v11  ;;  %v95_v18 = vld [vmem:[#allocation7 + $0x60] sm:$0xff]  ;;  %v101_v19 = vld [vmem:[#allocation7 + $0x90] sm:$0xff] }
  0x5e   :  { %1708 = vmatpush1.bf16.msra.mxu1 %v1707_v8  ;;  %v1773_v17 = vpack.c.bf16 %v294_v15, %v288_v14  ;;  %v287_v20 = vld [vmem:[#allocation7 + $0x660] sm:$0xff]  ;;  %v1711_v21 = vpack.c.bf16 %v101_v19, %v95_v18  ;;  %v293_v22 = vld [vmem:[#allocation7 + $0x690] sm:$0xff]  ;;  %v108_v23 = vld [vmem:[#allocation7 + $0xc8] sm:$0xff]  ;;  %p2436_p1 = por %p2435_p0, %p2434_p13 }
  0x5f   :  { %1772 = vmatpush1.bf16.msra.mxu0 %v1771_v12  ;;  %v114_v24 = vld [vmem:[#allocation7 + $0xf8] sm:$0xff]  ;;  %1710 = vmatprep.subr.bf16.mxu1 %v1709_v16  ;;  %v1775_v25 = vpack.c.bf16 %v293_v22, %v287_v20  ;;  %v300_v27 = vld [vmem:[#allocation7 + $0x6c8] sm:$0xff]  ;;  %v107_v29 = vld [vmem:[#allocation7 + $0xc0] sm:$0xff] }
  0x60   :  { %1774 = vmatprep.subr.bf16.mxu0 %v1773_v17  ;;  %v1713_v26 = vpack.c.bf16 %v114_v24, %v108_v23  ;;  %v306_v28 = vld [vmem:[#allocation7 + $0x6f8] sm:$0xff]  ;;  %v113_v31 = vld [vmem:[#allocation7 + $0xf0] sm:$0xff]  ;;  %v299_v32 = vld [vmem:[#allocation7 + $0x6c0] sm:$0xff]  ;;  %p2437_p2 = pnand %p2436_p1, %p2430_p12 }
  0x61   :  { %v1777_v30 = vpack.c.bf16 %v306_v28, %v300_v27  ;;  %v305_v33 = vld [vmem:[#allocation7 + $0x6f0] sm:$0xff]  ;;  %v1715_v34 = vpack.c.bf16 %v113_v31, %v107_v29  ;;  %v120_v35 = vld [vmem:[#allocation7 + $0x128] sm:$0xff]  ;;  %v126_v36 = vld [vmem:[#allocation7 + $0x158] sm:$0xff] }
  0x62   :  { %1712 = vmatpush1.bf16.msra.mxu1 %v1711_v21  ;;  %v312_v37 = vld [vmem:[#allocation7 + $0x728] sm:$0xff]  ;;  %v1779_v38 = vpack.c.bf16 %v305_v33, %v299_v32  ;;  %v1717_v39 = vpack.c.bf16 %v126_v36, %v120_v35  ;;  %v318_v40 = vld [vmem:[#allocation7 + $0x758] sm:$0xff]  ;;  %v119_v41 = vld [vmem:[#allocation7 + $0x120] sm:$0xff] }
  0x63   :  { %1776 = vmatpush1.bf16.msra.mxu0 %v1775_v25  ;;  %1714 = vmatprep.subr.bf16.mxu1 %v1713_v26  ;;  %v125_v42 = vld [vmem:[#allocation7 + $0x150] sm:$0xff]  ;;  %v1781_v43 = vpack.c.bf16 %v318_v40, %v312_v37  ;;  %v311_v44 = vld [vmem:[#allocation7 + $0x720] sm:$0xff]  ;;  %v132_v46 = vld [vmem:[#allocation7 + $0x188] sm:$0xff] }
  0x64   :  { %1778 = vmatprep.subr.bf16.mxu0 %v1777_v30  ;;  %v317_v45 = vld [vmem:[#allocation7 + $0x750] sm:$0xff]  ;;  %v138_v47 = vld [vmem:[#allocation7 + $0x1b8] sm:$0xff]  ;;  %v324_v48 = vld [vmem:[#allocation7 + $0x788] sm:$0xff]  ;;  %v1719_v50 = vpack.c.bf16 %v125_v42, %v119_v41 }
  0x65   :  { %v330_v49 = vld [vmem:[#allocation7 + $0x7b8] sm:$0xff]  ;;  %v1783_v51 = vpack.c.bf16 %v317_v45, %v311_v44  ;;  %v1721_v52 = vpack.c.bf16 %v138_v47, %v132_v46  ;;  %v131_v53 = vld [vmem:[#allocation7 + $0x180] sm:$0xff]  ;;  %v137_v54 = vld [vmem:[#allocation7 + $0x1b0] sm:$0xff]  ;;  %v671_v46 = vlaneseq  ;;  %v2466_v47 = vmov 1983009808  }
  0x66   :  { %1716 = vmatpush1.bf16.msra.mxu1 %v1715_v34  ;;  %v323_v55 = vld [vmem:[#allocation7 + $0x780] sm:$0xff]  ;;  %v1785_v56 = vpack.c.bf16 %v330_v49, %v324_v48  ;;  %v329_v57 = vld [vmem:[#allocation7 + $0x7b0] sm:$0xff]  ;;  %v144_v58 = vld [vmem:[#allocation7 + $0x1e8] sm:$0xff]  ;;  %v1723_v62 = vpack.c.bf16 %v137_v54, %v131_v53  ;;  %v735_v48 = vunpack.c.l.s4 %v2466_v47 }
  0x67   :  { %1780 = vmatpush1.bf16.msra.mxu0 %v1779_v38  ;;  %1718 = vmatprep.subr.bf16.mxu1 %v1717_v39  ;;  %v150_v59 = vld [vmem:[#allocation7 + $0x218] sm:$0xff]  ;;  %v336_v60 = vld [vmem:[#allocation7 + $0x7e8] sm:$0xff]  ;;  %v1787_v63 = vpack.c.bf16 %v329_v57, %v323_v55  ;;  %v143_v1 = vld [vmem:[#allocation7 + $0x1e0] sm:$0xff] }
  0x68   :  { %1782 = vmatprep.subr.bf16.mxu0 %v1781_v43  ;;  %v342_v61 = vld [vmem:[#allocation7 + $0x818] sm:$0xff]  ;;  %v1725_v0 = vpack.c.bf16 %v150_v59, %v144_v58  ;;  %v149_v2 = vld [vmem:[#allocation7 + $0x210] sm:$0xff]  ;;  %v335_v3 = vld [vmem:[#allocation7 + $0x7e0] sm:$0xff] }
  0x69   :  { %v1789_v4 = vpack.c.bf16 %v342_v61, %v336_v60  ;;  %v341_v5 = vld [vmem:[#allocation7 + $0x810] sm:$0xff]  ;;  %v156_v6 = vld [vmem:[#allocation7 + $0x248] sm:$0xff]  ;;  %v162_v7 = vld [vmem:[#allocation7 + $0x278] sm:$0xff]  ;;  %v1727_v10 = vpack.c.bf16 %v149_v2, %v143_v1  ;;  %v2569_v61 = vshrl.u32 %v671_v46, 7 }
  0x6a   :  { %1720 = vmatpush1.bf16.msra.mxu1 %v1719_v50  ;;  %v348_v8 = vld [vmem:[#allocation7 + $0x848] sm:$0xff]  ;;  %v354_v9 = vld [vmem:[#allocation7 + $0x878] sm:$0xff]  ;;  %v1791_v11 = vpack.c.bf16 %v341_v5, %v335_v3  ;;  %v1729_v12 = vpack.c.bf16 %v162_v7, %v156_v6  ;;  %v155_v13 = vld [vmem:[#allocation7 + $0x240] sm:$0xff] }
  0x6b   :  { %1784 = vmatpush1.bf16.msra.mxu0 %v1783_v51  ;;  %1722 = vmatprep.subr.bf16.mxu1 %v1721_v52  ;;  %v161_v14 = vld [vmem:[#allocation7 + $0x270] sm:$0xff]  ;;  %v347_v15 = vld [vmem:[#allocation7 + $0x840] sm:$0xff]  ;;  %v1793_v16 = vpack.c.bf16 %v354_v9, %v348_v8  ;;  %v168_v18 = vld [vmem:[#allocation7 + $0x2a8] sm:$0xff] }
  0x6c   :  { %1786 = vmatprep.subr.bf16.mxu0 %v1785_v56  ;;  %v353_v17 = vld [vmem:[#allocation7 + $0x870] sm:$0xff]  ;;  %v174_v19 = vld [vmem:[#allocation7 + $0x2d8] sm:$0xff]  ;;  %v360_v20 = vld [vmem:[#allocation7 + $0x8a8] sm:$0xff]  ;;  %v1731_v22 = vpack.c.bf16 %v161_v14, %v155_v13 }
  0x6d   :  { %v366_v21 = vld [vmem:[#allocation7 + $0x8d8] sm:$0xff]  ;;  %v1795_v23 = vpack.c.bf16 %v353_v17, %v347_v15  ;;  %v1733_v24 = vpack.c.bf16 %v174_v19, %v168_v18  ;;  %v167_v25 = vld [vmem:[#allocation7 + $0x2a0] sm:$0xff]  ;;  %v173_v26 = vld [vmem:[#allocation7 + $0x2d0] sm:$0xff] }
  0x6e   :  { %1724 = vmatpush1.bf16.msra.mxu1 %v1723_v62  ;;  %v359_v27 = vld [vmem:[#allocation7 + $0x8a0] sm:$0xff]  ;;  %v1797_v28 = vpack.c.bf16 %v366_v21, %v360_v20  ;;  %v365_v29 = vld [vmem:[#allocation7 + $0x8d0] sm:$0xff]  ;;  %v180_v30 = vld [vmem:[#allocation7 + $0x308] sm:$0xff]  ;;  %v1735_v34 = vpack.c.bf16 %v173_v26, %v167_v25  ;;  %v736_v62 = vunpack.c.0.s8 %v735_v48 }
  0x6f   :  { %1788 = vmatpush1.bf16.msra.mxu0 %v1787_v63  ;;  %1726 = vmatprep.subr.bf16.mxu1 %v1725_v0  ;;  %v186_v31 = vld [vmem:[#allocation7 + $0x338] sm:$0xff]  ;;  %v372_v32 = vld [vmem:[#allocation7 + $0x908] sm:$0xff]  ;;  %v1799_v35 = vpack.c.bf16 %v365_v29, %v359_v27  ;;  %v179_v37 = vld [vmem:[#allocation7 + $0x300] sm:$0xff] }
  0x70   :  { %1790 = vmatprep.subr.bf16.mxu0 %v1789_v4  ;;  %v378_v33 = vld [vmem:[#allocation7 + $0x938] sm:$0xff]  ;;  %v1737_v36 = vpack.c.bf16 %v186_v31, %v180_v30  ;;  %v185_v38 = vld [vmem:[#allocation7 + $0x330] sm:$0xff]  ;;  %v371_v39 = vld [vmem:[#allocation7 + $0x900] sm:$0xff] }
  0x71   :  { %v1801_v40 = vpack.c.bf16 %v378_v33, %v372_v32  ;;  %v377_v41 = vld [vmem:[#allocation7 + $0x930] sm:$0xff]  ;;  %v192_v42 = vld [vmem:[#allocation7 + $0x368] sm:$0xff]  ;;  %v198_v43 = vld [vmem:[#allocation7 + $0x398] sm:$0xff]  ;;  %v1739_v49 = vpack.c.bf16 %v185_v38, %v179_v37 }
  0x72   :  { %1728 = vmatpush1.bf16.msra.mxu1 %v1727_v10  ;;  %v384_v44 = vld [vmem:[#allocation7 + $0x968] sm:$0xff]  ;;  %v390_v45 = vld [vmem:[#allocation7 + $0x998] sm:$0xff]  ;;  %v1803_v50 = vpack.c.bf16 %v377_v41, %v371_v39  ;;  %v1741_v51 = vpack.c.bf16 %v198_v43, %v192_v42  ;;  %v191_v52 = vld [vmem:[#allocation7 + $0x360] sm:$0xff] }
  0x73   :  { %1792 = vmatpush1.bf16.msra.mxu0 %v1791_v11  ;;  %1730 = vmatprep.subr.bf16.mxu1 %v1729_v12  ;;  %v197_v53 = vld [vmem:[#allocation7 + $0x390] sm:$0xff]  ;;  %v383_v54 = vld [vmem:[#allocation7 + $0x960] sm:$0xff]  ;;  %v1805_v55 = vpack.c.bf16 %v390_v45, %v384_v44  ;;  %v204_v57 = vld [vmem:[#allocation7 + $0x3c8] sm:$0xff]  ;;  %v2572_v11 = vsub.s32 %v736_v62, %v2569_v61 }
  0x74   :  { %1794 = vmatprep.subr.bf16.mxu0 %v1793_v16  ;;  %v389_v56 = vld [vmem:[#allocation7 + $0x990] sm:$0xff]  ;;  %v210_v58 = vld [vmem:[#allocation7 + $0x3f8] sm:$0xff]  ;;  %v396_v59 = vld [vmem:[#allocation7 + $0x9c8] sm:$0xff]  ;;  %v1743_v63 = vpack.c.bf16 %v197_v53, %v191_v52 }
  0x75   :  { %v402_v60 = vld [vmem:[#allocation7 + $0x9f8] sm:$0xff]  ;;  %v1807_v0 = vpack.c.bf16 %v389_v56, %v383_v54  ;;  %v1745_v1 = vpack.c.bf16 %v210_v58, %v204_v57  ;;  %v203_v2 = vld [vmem:[#allocation7 + $0x3c0] sm:$0xff]  ;;  %v209_v3 = vld [vmem:[#allocation7 + $0x3f0] sm:$0xff] }
  0x76   :  { %1732 = vmatpush1.bf16.msra.mxu1 %v1731_v22  ;;  %v395_v4 = vld [vmem:[#allocation7 + $0x9c0] sm:$0xff]  ;;  %v1809_v5 = vpack.c.bf16 %v402_v60, %v396_v59  ;;  %v401_v6 = vld [vmem:[#allocation7 + $0x9f0] sm:$0xff]  ;;  %v216_v7 = vld [vmem:[#allocation7 + $0x428] sm:$0xff]  ;;  %v1747_v12 = vpack.c.bf16 %v209_v3, %v203_v2 }
  0x77   :  { %1796 = vmatpush1.bf16.msra.mxu0 %v1795_v23  ;;  %1734 = vmatprep.subr.bf16.mxu1 %v1733_v24  ;;  %v222_v8 = vld [vmem:[#allocation7 + $0x458] sm:$0xff]  ;;  %v408_v9 = vld [vmem:[#allocation7 + $0xa28] sm:$0xff]  ;;  %v215_v13 = vld [vmem:[#allocation7 + $0x420] sm:$0xff]  ;;  %v1811_v14 = vpack.c.bf16 %v401_v6, %v395_v4 }
  0x78   :  { %1798 = vmatprep.subr.bf16.mxu0 %v1797_v28  ;;  %v414_v10 = vld [vmem:[#allocation7 + $0xa58] sm:$0xff]  ;;  %v1749_v15 = vpack.c.bf16 %v222_v8, %v216_v7  ;;  %v221_v16 = vld [vmem:[#allocation7 + $0x450] sm:$0xff]  ;;  %v407_v17 = vld [vmem:[#allocation7 + $0xa20] sm:$0xff] }
  0x79   :  { %v413_v18 = vld [vmem:[#allocation7 + $0xa50] sm:$0xff]  ;;  %v1813_v19 = vpack.c.bf16 %v414_v10, %v408_v9  ;;  %v228_v20 = vld [vmem:[#allocation7 + $0x488] sm:$0xff]  ;;  %v234_v21 = vld [vmem:[#allocation7 + $0x4b8] sm:$0xff]  ;;  %v1751_v27 = vpack.c.bf16 %v221_v16, %v215_v13 }
  0x7a   :  { %1736 = vmatpush1.bf16.msra.mxu1 %v1735_v34  ;;  %v81_v22 = vld [vmem:[#allocation2] sm:$0xff]  ;;  %v420_v23 = vld [vmem:[#allocation7 + $0xa88] sm:$0xff]  ;;  %v1815_v28 = vpack.c.bf16 %v413_v18, %v407_v17  ;;  %v1753_v29 = vpack.c.bf16 %v234_v21, %v228_v20  ;;  %v227_v30 = vld [vmem:[#allocation7 + $0x480] sm:$0xff] }
  0x7b   :  { %1800 = vmatpush1.bf16.msra.mxu0 %v1799_v35  ;;  %1738 = vmatprep.subr.bf16.mxu1 %v1737_v36  ;;  %v426_v24 = vld [vmem:[#allocation7 + $0xab8] sm:$0xff]  ;;  %v2575_v25 = vrot.slane %v81_v22, %v2572_v11  ;;  %v733_v26 = vcombine.high %v81_v22, %v81_v22  ;;  %v233_v31 = vld [vmem:[#allocation7 + $0x4b0] sm:$0xff]  ;;  %v419_v32 = vld [vmem:[#allocation7 + $0xa80] sm:$0xff] }
  0x7c   :  { %1802 = vmatprep.subr.bf16.mxu0 %v1801_v40  ;;  %v1817_v35 = vpack.c.bf16 %v426_v24, %v420_v23  ;;  %v425_v36 = vld [vmem:[#allocation7 + $0xab0] sm:$0xff]  ;;  %v240_v37 = vld [vmem:[#allocation7 + $0x4e8] sm:$0xff]  ;;  %v246_v38 = vld [vmem:[#allocation7 + $0x518] sm:$0xff]  ;;  %v1755_v42 = vpack.c.bf16 %v233_v31, %v227_v30 }
  0x7d   :  { %v2579_v33 = vcombine.high %v2575_v25, %v2575_v25  ;;  %v2582_v34 = vrot.slane %v733_v26, %v2572_v11  ;;  %v432_v39 = vld [vmem:[#allocation7 + $0xae8] sm:$0xff]  ;;  %v438_v40 = vld [vmem:[#allocation7 + $0xb18] sm:$0xff]  ;;  %v1819_v43 = vpack.c.bf16 %v425_v36, %v419_v32  ;;  %v1757_v44 = vpack.c.bf16 %v246_v38, %v240_v37  ;;  %v239_v45 = vld [vmem:[#allocation7 + $0x4e0] sm:$0xff] }
  0x7e   :  { %1740 = vmatpush1.bf16.msra.mxu1 %v1739_v49  ;;  %v245_v46 = vld [vmem:[#allocation7 + $0x510] sm:$0xff]  ;;  %v431_v47 = vld [vmem:[#allocation7 + $0xae0] sm:$0xff]  ;;  %v1821_v48 = vpack.c.bf16 %v438_v40, %v432_v39  ;;  %v444_v52 = vld [vmem:[#allocation7 + $0xb48] sm:$0xff] }
  0x7f   :  { %1804 = vmatpush1.bf16.msra.mxu0 %v1803_v50  ;;  %1742 = vmatprep.subr.bf16.mxu1 %v1741_v51  ;;  %v2587_v41 = vcombine.high %v2582_v34, %v2582_v34  ;;  %v437_v49 = vld [vmem:[#allocation7 + $0xb10] sm:$0xff]  ;;  %v252_v50 = vld [vmem:[#allocation7 + $0x548] sm:$0xff]  ;;  %v258_v51 = vld [vmem:[#allocation7 + $0x578] sm:$0xff]  ;;  %v1759_v54 = vpack.c.bf16 %v245_v46, %v239_v45 }
  0x80   :  { %1806 = vmatprep.subr.bf16.mxu0 %v1805_v55  ;;  %828 = vmatprep.mubr.f32.mxu1 %v2579_v33  ;;  %v450_v53 = vld [vmem:[#allocation7 + $0xb78] sm:$0xff]  ;;  %v1823_v55 = vpack.c.bf16 %v437_v49, %v431_v47  ;;  %v1761_v56 = vpack.c.bf16 %v258_v51, %v252_v50  ;;  %v251_v57 = vld [vmem:[#allocation7 + $0x540] sm:$0xff]  ;;  %v257_v58 = vld [vmem:[#allocation7 + $0x570] sm:$0xff] }
  0x81   :  { %899 = vmatprep.mubr.f32.mxu0 %v2587_v41  ;;  %v443_v59 = vld [vmem:[#allocation7 + $0xb40] sm:$0xff]  ;;  %v1825_v60 = vpack.c.bf16 %v450_v53, %v444_v52  ;;  %v449_v62 = vld [vmem:[#allocation7 + $0xb70] sm:$0xff]  ;;  %v462_v2 = vld [vmem:[#allocation7 + $0xbd8] sm:$0xff]  ;;  %v1763_v3 = vpack.c.bf16 %v257_v58, %v251_v57 }
  0x82   :  { %1744 = vmatpush1.bf16.msra.mxu1 %v1743_v63  ;;  %v264_v63 = vld [vmem:[#allocation7 + $0x5a8] sm:$0xff]  ;;  %v1827_v4 = vpack.c.bf16 %v449_v62, %v443_v59  ;;  %v263_v6 = vld [vmem:[#allocation7 + $0x5a0] sm:$0xff]  ;;  %v269_v7 = vld [vmem:[#allocation7 + $0x5d0] sm:$0xff] }
  0x83   :  { %1808 = vmatpush1.bf16.msra.mxu0 %v1807_v0  ;;  %1746 = vmatprep.subr.bf16.mxu1 %v1745_v1  ;;  %v270_v0 = vld [vmem:[#allocation7 + $0x5d8] sm:$0xff]  ;;  %v456_v1 = vld [vmem:[#allocation7 + $0xba8] sm:$0xff]  ;;  %v455_v8 = vld [vmem:[#allocation7 + $0xba0] sm:$0xff]  ;;  %v1767_v16 = vpack.c.bf16 %v269_v7, %v263_v6 }
  0x84   :  { %1810 = vmatprep.subr.bf16.mxu0 %v1809_v5  ;;  %v1765_v5 = vpack.c.bf16 %v270_v0, %v264_v63  ;;  %v1829_v9 = vpack.c.bf16 %v462_v2, %v456_v1  ;;  %v461_v10 = vld [vmem:[#allocation7 + $0xbd0] sm:$0xff]  ;;  %v92_v13 = vld [vmem:[#allocation7 + $0x48] sm:$0xff]  ;;  %v91_v21 = vld [vmem:[#allocation7 + $0x40] sm:$0xff] }
  0x85   :  { %v1831_v17 = vpack.c.bf16 %v461_v10, %v455_v8  ;;  %v85_v20 = vld [vmem:[#allocation7 + $0x10] sm:$0xff]  ;;  %v98_v24 = vld [vmem:[#allocation7 + $0x78] sm:$0xff]  ;;  %v104_v26 = vld [vmem:[#allocation7 + $0xa8] sm:$0xff] }
  0x86   :  { %1748 = vmatpush1.bf16.msra.mxu1 %v1747_v12  ;;  %v86_v12 = vld [vmem:[#allocation7 + $0x18] sm:$0xff]  ;;  %v473_v23 = vld [vmem:[#allocation7 + $0xc30] sm:$0xff]  ;;  %v1901_v31 = vpack.c.bf16 %v104_v26, %v98_v24  ;;  %v479_v32 = vld [vmem:[#allocation7 + $0xc60] sm:$0xff] }
  0x87   :  { %1812 = vmatpush1.bf16.msra.mxu0 %v1811_v14  ;;  %1750 = vmatprep.subr.bf16.mxu1 %v1749_v15  ;;  %v468_v14 = vld [vmem:[#allocation7 + $0xc08] sm:$0xff]  ;;  %v474_v15 = vld [vmem:[#allocation7 + $0xc38] sm:$0xff]  ;;  %v1897_v18 = vpack.c.bf16 %v92_v13, %v86_v12  ;;  %v103_v36 = vld [vmem:[#allocation7 + $0xa0] sm:$0xff] }
  0x88   :  { %1814 = vmatprep.subr.bf16.mxu0 %v1813_v19  ;;  %v467_v19 = vld [vmem:[#allocation7 + $0xc00] sm:$0xff]  ;;  %v1833_v22 = vpack.c.bf16 %v474_v15, %v468_v14  ;;  %v485_v38 = vld [vmem:[#allocation7 + $0xc90] sm:$0xff]  ;;  %v110_v39 = vld [vmem:[#allocation7 + $0xd8] sm:$0xff] }
  0x89   :  { %v1835_v30 = vpack.c.bf16 %v473_v23, %v467_v19  ;;  %v116_v40 = vld [vmem:[#allocation7 + $0x108] sm:$0xff]  ;;  %v1839_v45 = vpack.c.bf16 %v485_v38, %v479_v32  ;;  %v491_v47 = vld [vmem:[#allocation7 + $0xcc0] sm:$0xff]  ;;  %v497_v51 = vld [vmem:[#allocation7 + $0xcf0] sm:$0xff] }
  0x8a   :  { %1752 = vmatpush1.bf16.msra.mxu1 %v1751_v27  ;;  %v480_v27 = vld [vmem:[#allocation7 + $0xc68] sm:$0xff]  ;;  %v1905_v46 = vpack.c.bf16 %v116_v40, %v110_v39  ;;  %v115_v49 = vld [vmem:[#allocation7 + $0x100] sm:$0xff]  ;;  %v122_v52 = vld [vmem:[#allocation7 + $0x138] sm:$0xff]  ;;  %v1843_v57 = vpack.c.bf16 %v497_v51, %v491_v47 }
  0x8b   :  { %1816 = vmatpush1.bf16.msra.mxu0 %v1815_v28  ;;  %1754 = vmatprep.subr.bf16.mxu1 %v1753_v29  ;;  %v486_v28 = vld [vmem:[#allocation7 + $0xc98] sm:$0xff]  ;;  %v1899_v29 = vpack.c.bf16 %v91_v21, %v85_v20  ;;  %v128_v53 = vld [vmem:[#allocation7 + $0x168] sm:$0xff]  ;;  %v503_v59 = vld [vmem:[#allocation7 + $0xd20] sm:$0xff] }
  0x8c   :  { %1818 = vmatprep.subr.bf16.mxu0 %v1817_v35  ;;  %v97_v35 = vld [vmem:[#allocation7 + $0x70] sm:$0xff]  ;;  %v1837_v37 = vpack.c.bf16 %v486_v28, %v480_v27  ;;  %v1909_v58 = vpack.c.bf16 %v128_v53, %v122_v52  ;;  %v127_v62 = vld [vmem:[#allocation7 + $0x160] sm:$0xff]  ;;  %v134_v1 = vld [vmem:[#allocation7 + $0x198] sm:$0xff] }
  0x8d   :  { %v509_v0 = vld [vmem:[#allocation7 + $0xd50] sm:$0xff]  ;;  %v140_v2 = vld [vmem:[#allocation7 + $0x1c8] sm:$0xff]  ;;  %v515_v8 = vld [vmem:[#allocation7 + $0xd80] sm:$0xff] }
  0x8e   :  { %1756 = vmatpush1.bf16.msra.mxu1 %v1755_v42  ;;  %v492_v42 = vld [vmem:[#allocation7 + $0xcc8] sm:$0xff]  ;;  %v1847_v6 = vpack.c.bf16 %v509_v0, %v503_v59  ;;  %v1913_v7 = vpack.c.bf16 %v140_v2, %v134_v1  ;;  %v139_v10 = vld [vmem:[#allocation7 + $0x1c0] sm:$0xff]  ;;  %v521_v13 = vld [vmem:[#allocation7 + $0xdb0] sm:$0xff] }
  0x8f   :  { %1820 = vmatpush1.bf16.msra.mxu0 %v1819_v43  ;;  %1758 = vmatprep.subr.bf16.mxu1 %v1757_v44  ;;  %v498_v43 = vld [vmem:[#allocation7 + $0xcf8] sm:$0xff]  ;;  %v1903_v44 = vpack.c.bf16 %v103_v36, %v97_v35  ;;  %v152_v15 = vld [vmem:[#allocation7 + $0x228] sm:$0xff]  ;;  %v1851_v19 = vpack.c.bf16 %v521_v13, %v515_v8  ;;  %v527_v21 = vld [vmem:[#allocation7 + $0xde0] sm:$0xff] }
  0x90   :  { %1822 = vmatprep.subr.bf16.mxu0 %v1821_v48  ;;  %v109_v48 = vld [vmem:[#allocation7 + $0xd0] sm:$0xff]  ;;  %v1841_v50 = vpack.c.bf16 %v498_v43, %v492_v42  ;;  %v146_v14 = vld [vmem:[#allocation7 + $0x1f8] sm:$0xff]  ;;  %v151_v23 = vld [vmem:[#allocation7 + $0x220] sm:$0xff] }
  0x91   :  { %v1917_v20 = vpack.c.bf16 %v152_v15, %v146_v14  ;;  %v533_v26 = vld [vmem:[#allocation7 + $0xe10] sm:$0xff]  ;;  %v158_v27 = vld [vmem:[#allocation7 + $0x258] sm:$0xff]  ;;  %v164_v28 = vld [vmem:[#allocation7 + $0x288] sm:$0xff] }
  0x92   :  { %1760 = vmatpush1.bf16.msra.mxu1 %v1759_v54  ;;  %v504_v54 = vld [vmem:[#allocation7 + $0xd28] sm:$0xff]  ;;  %v539_v35 = vld [vmem:[#allocation7 + $0xe40] sm:$0xff]  ;;  %v1855_v36 = vpack.c.bf16 %v533_v26, %v527_v21  ;;  %v157_v38 = vld [vmem:[#allocation7 + $0x250] sm:$0xff] }
  0x93   :  { %1824 = vmatpush1.bf16.msra.mxu0 %v1823_v55  ;;  %1762 = vmatprep.subr.bf16.mxu1 %v1761_v56  ;;  %v510_v55 = vld [vmem:[#allocation7 + $0xd58] sm:$0xff]  ;;  %v1907_v56 = vpack.c.bf16 %v115_v49, %v109_v48  ;;  %v163_v39 = vld [vmem:[#allocation7 + $0x280] sm:$0xff]  ;;  %v545_v43 = vld [vmem:[#allocation7 + $0xe70] sm:$0xff]  ;;  %v2468_v49 = vmov 2  }
  0x94   :  { %1826 = vmatprep.subr.bf16.mxu0 %v1825_v60  ;;  %v121_v60 = vld [vmem:[#allocation7 + $0x130] sm:$0xff]  ;;  %v1845_v63 = vpack.c.bf16 %v510_v55, %v504_v54  ;;  %v2593_v40 = vld.sshfl [vmem:[#allocation2 + $0x8] sm:$0x33 pattern:$0x76325410]  ;;  %v552_v47 = vld [vmem:[#allocation7 + $0xea8] sm:$0xff]  ;;  %2314 = vset.pattern.permute.xlu1 %v2468_v49  ;;  %v1859_v51 = vpack.c.bf16 %v545_v43, %v539_v35 }
  0x95   :  { %v558_v48 = vld [vmem:[#allocation7 + $0xed8] sm:$0xff]  ;;  %v551_v53 = vld [vmem:[#allocation7 + $0xea0] sm:$0xff]  ;;  %v169_v54 = vld [vmem:[#allocation7 + $0x2b0] sm:$0xff] }
  0x96   :  { %1764 = vmatpush1.bf16.msra.mxu1 %v1763_v3  ;;  %v516_v3 = vld [vmem:[#allocation7 + $0xd88] sm:$0xff]  ;;  %v175_v55 = vld [vmem:[#allocation7 + $0x2e0] sm:$0xff]  ;;  %v218_v35 = vld [vmem:[#allocation7 + $0x438] sm:$0xff] }
  0x97   :  { %1828 = vmatpush1.bf16.msra.mxu0 %v1827_v4  ;;  %1766 = vmatprep.subr.bf16.mxu1 %v1765_v5  ;;  %v522_v4 = vld [vmem:[#allocation7 + $0xdb8] sm:$0xff]  ;;  %v1911_v5 = vpack.c.bf16 %v127_v62, %v121_v60  ;;  %v188_v59 = vld [vmem:[#allocation7 + $0x348] sm:$0xff]  ;;  %v563_v2 = vld [vmem:[#allocation7 + $0xf00] sm:$0xff] }
  0x98   :  { %1830 = vmatprep.subr.bf16.mxu0 %v1829_v9  ;;  %v133_v9 = vld [vmem:[#allocation7 + $0x190] sm:$0xff]  ;;  %v1849_v12 = vpack.c.bf16 %v522_v4, %v516_v3  ;;  %v564_v60 = vld [vmem:[#allocation7 + $0xf08] sm:$0xff]  ;;  %v570_v62 = vld [vmem:[#allocation7 + $0xf38] sm:$0xff] }
  0x99   :  { %v181_v3 = vld [vmem:[#allocation7 + $0x310] sm:$0xff]  ;;  %v187_v4 = vld [vmem:[#allocation7 + $0x340] sm:$0xff]  ;;  %v200_v8 = vld [vmem:[#allocation7 + $0x3a8] sm:$0xff] }
  0x9a   :  { %1768 = vmatpush1.bf16.msra.mxu1 %v1767_v16  ;;  %v528_v16 = vld [vmem:[#allocation7 + $0xde8] sm:$0xff]  ;;  %v575_v15 = vld [vmem:[#allocation7 + $0xf60] sm:$0xff]  ;;  %v605_v49 = vld [vmem:[#allocation7 + $0x1050] sm:$0xff] }
  0x9b   :  { %1832 = vmatpush1.bf16.msra.mxu0 %v1831_v17  ;;  %1898 = vmatprep.subr.bf16.mxu1 %v1897_v18  ;;  %v534_v17 = vld [vmem:[#allocation7 + $0xe18] sm:$0xff]  ;;  %v1915_v18 = vpack.c.bf16 %v139_v10, %v133_v9  ;;  %v576_v9 = vld [vmem:[#allocation7 + $0xf68] sm:$0xff] }
  0x9c   :  { %1834 = vmatprep.subr.bf16.mxu0 %v1833_v22  ;;  %v145_v22 = vld [vmem:[#allocation7 + $0x1f0] sm:$0xff]  ;;  %v1853_v24 = vpack.c.bf16 %v534_v17, %v528_v16  ;;  %v582_v10 = vld [vmem:[#allocation7 + $0xf98] sm:$0xff]  ;;  %v199_v17 = vld [vmem:[#allocation7 + $0x3a0] sm:$0xff] }
  0x9d   :  { %829 = vmatmul.mubr.f32.vlgmr.msra.gmra.mrb[0].mxu1 %v2575_v25  ;;  %v1919_v32 = vpack.c.bf16 %v151_v23, %v145_v22  ;;  %v193_v16 = vld [vmem:[#allocation7 + $0x370] sm:$0xff]  ;;  %v212_v21 = vld [vmem:[#allocation7 + $0x408] sm:$0xff]  ;;  %v594_v23 = vld [vmem:[#allocation7 + $0xff8] sm:$0xff] }
  0x9e   :  { %900 = vmatmul.mubr.f32.vlgmr.msra.gmra.mrb[0].mxu0 %v2582_v34  ;;  %1900 = vmatpush1.bf16.msra.mxu1 %v1899_v29  ;;  %v2467_v29 = vmov 0   ;;  %v588_v22 = vld [vmem:[#allocation7 + $0xfc8] sm:$0xff] }
  0x9f   :  { %1836 = vmatpush1.bf16.msra.mxu0 %v1835_v30  ;;  %1902 = vmatprep.subr.bf16.mxu1 %v1901_v31  ;;  %v540_v30 = vld [vmem:[#allocation7 + $0xe48] sm:$0xff]  ;;  %v546_v31 = vld [vmem:[#allocation7 + $0xe78] sm:$0xff] }
  0xa0   :  { %1838 = vmatprep.subr.bf16.mxu0 %v1837_v37  ;;  %1041 = vmatprep.mubr.f32.mxu1 %v2579_v33  ;;  %v1921_v37 = vpack.c.bf16 %v164_v28, %v158_v27  ;;  %v1857_v42 = vpack.c.bf16 %v546_v31, %v540_v30  ;;  %v587_v28 = vld [vmem:[#allocation7 + $0xfc0] sm:$0xff]  ;;  %v1873_v31 = vpack.c.bf16 %v594_v23, %v588_v22  ;;  %v641_v23 = vld [vmem:[#allocation7 + $0x1170] sm:$0xff] }
  0xa1   :  { %2312 = vset.pattern.permute.xlu0 %v2467_v29  ;;  %v205_v29 = vld [vmem:[#allocation7 + $0x3d0] sm:$0xff]  ;;  %v211_v30 = vld [vmem:[#allocation7 + $0x400] sm:$0xff] }
  0xa2   :  { %1904 = vmatpush1.bf16.msra.mxu1 %v1903_v44  ;;  %v170_v44 = vld [vmem:[#allocation7 + $0x2b8] sm:$0xff] }
  0xa3   :  { %1840 = vmatpush1.bf16.msra.mxu0 %v1839_v45  ;;  %1906 = vmatprep.subr.bf16.mxu1 %v1905_v46  ;;  %v176_v45 = vld [vmem:[#allocation7 + $0x2e8] sm:$0xff]  ;;  %v2597_v46 = vcombine.high %v2593_v40, %v2593_v40 }
  0xa4   :  { %1842 = vmatprep.subr.bf16.mxu0 %v1841_v50  ;;  %v1923_v50 = vpack.c.bf16 %v163_v39, %v157_v38  ;;  %v1925_v52 = vpack.c.bf16 %v176_v45, %v170_v44  ;;  %v606_v38 = vld [vmem:[#allocation7 + $0x1058] sm:$0xff]  ;;  %v1939_v39 = vpack.c.bf16 %v211_v30, %v205_v29  ;;  %v599_v44 = vld [vmem:[#allocation7 + $0x1020] sm:$0xff]  ;;  %v217_v45 = vld [vmem:[#allocation7 + $0x430] sm:$0xff] }
  0xa5   :  { %970 = vmatprep.mubr.f32.mxu0 %v2597_v46 }
  0xa6   :  { %1908 = vmatpush1.bf16.msra.mxu1 %v1907_v56  ;;  %v1861_v56 = vpack.c.bf16 %v558_v48, %v552_v47  ;;  %v223_v47 = vld [vmem:[#allocation7 + $0x460] sm:$0xff] }
  0xa7   :  { %1844 = vmatpush1.bf16.msra.mxu0 %v1843_v57  ;;  %1910 = vmatprep.subr.bf16.mxu1 %v1909_v58  ;;  %v557_v57 = vld [vmem:[#allocation7 + $0xed0] sm:$0xff]  ;;  %v182_v58 = vld [vmem:[#allocation7 + $0x318] sm:$0xff] }
  0xa8   :  { %1846 = vmatprep.subr.bf16.mxu0 %v1845_v63  ;;  %v1927_v63 = vpack.c.bf16 %v175_v55, %v169_v54  ;;  %v1863_v0 = vpack.c.bf16 %v557_v57, %v551_v53  ;;  %v1929_v1 = vpack.c.bf16 %v188_v59, %v182_v58  ;;  %v618_v53 = vld [vmem:[#allocation7 + $0x10b8] sm:$0xff]  ;;  %v1943_v54 = vpack.c.bf16 %v223_v47, %v217_v45  ;;  %v611_v57 = vld [vmem:[#allocation7 + $0x1080] sm:$0xff]  ;;  %v229_v58 = vld [vmem:[#allocation7 + $0x490] sm:$0xff] }
  0xa9   :  { %v1879_v55 = vpack.c.bf16 %v605_v49, %v599_v44  ;;  %v235_v59 = vld [vmem:[#allocation7 + $0x4c0] sm:$0xff]  ;;  %v94_v44 = vld [vmem:[#allocation7 + $0x58] sm:$0xff]  ;;  %v277_v49 = vld [vmem:[#allocation7 + $0x610] sm:$0xff] }
  0xaa   :  { %1912 = vmatpush1.bf16.msra.mxu1 %v1911_v5  ;;  %v1865_v5 = vpack.c.bf16 %v570_v62, %v564_v60  ;;  %v617_v62 = vld [vmem:[#allocation7 + $0x10b0] sm:$0xff] }
  0xab   :  { %1848 = vmatpush1.bf16.msra.mxu0 %v1847_v6  ;;  %1914 = vmatprep.subr.bf16.mxu1 %v1913_v7  ;;  %v569_v6 = vld [vmem:[#allocation7 + $0xf30] sm:$0xff]  ;;  %v194_v7 = vld [vmem:[#allocation7 + $0x378] sm:$0xff] }
  0xac   :  { %1850 = vmatprep.subr.bf16.mxu0 %v1849_v12  ;;  %v1931_v12 = vpack.c.bf16 %v187_v4, %v181_v3  ;;  %v1867_v13 = vpack.c.bf16 %v569_v6, %v563_v2  ;;  %v1933_v14 = vpack.c.bf16 %v200_v8, %v194_v7  ;;  %v630_v2 = vld [vmem:[#allocation7 + $0x1118] sm:$0xff]  ;;  %v1947_v3 = vpack.c.bf16 %v235_v59, %v229_v58  ;;  %v623_v6 = vld [vmem:[#allocation7 + $0x10e0] sm:$0xff]  ;;  %v241_v7 = vld [vmem:[#allocation7 + $0x4f0] sm:$0xff] }
  0xad   :  { %v1883_v4 = vpack.c.bf16 %v617_v62, %v611_v57  ;;  %v247_v8 = vld [vmem:[#allocation7 + $0x520] sm:$0xff]  ;;  %v106_v57 = vld [vmem:[#allocation7 + $0xb8] sm:$0xff]  ;;  %v289_v62 = vld [vmem:[#allocation7 + $0x670] sm:$0xff] }
  0xae   :  { %1916 = vmatpush1.bf16.msra.mxu1 %v1915_v18  ;;  %v1869_v18 = vpack.c.bf16 %v582_v10, %v576_v9  ;;  %v629_v10 = vld [vmem:[#allocation7 + $0x1110] sm:$0xff] }
  0xaf   :  { %1852 = vmatpush1.bf16.msra.mxu0 %v1851_v19  ;;  %1918 = vmatprep.subr.bf16.mxu1 %v1917_v20  ;;  %v581_v19 = vld [vmem:[#allocation7 + $0xf90] sm:$0xff]  ;;  %v206_v20 = vld [vmem:[#allocation7 + $0x3d8] sm:$0xff] }
  0xb0   :  { %1854 = vmatprep.subr.bf16.mxu0 %v1853_v24  ;;  %v1935_v24 = vpack.c.bf16 %v199_v17, %v193_v16  ;;  %v1871_v26 = vpack.c.bf16 %v581_v19, %v575_v15  ;;  %v1937_v27 = vpack.c.bf16 %v212_v21, %v206_v20  ;;  %v642_v15 = vld [vmem:[#allocation7 + $0x1178] sm:$0xff]  ;;  %v1951_v16 = vpack.c.bf16 %v247_v8, %v241_v7  ;;  %v635_v19 = vld [vmem:[#allocation7 + $0x1140] sm:$0xff]  ;;  %v253_v20 = vld [vmem:[#allocation7 + $0x550] sm:$0xff] }
  0xb1   :  { %v1887_v17 = vpack.c.bf16 %v629_v10, %v623_v6  ;;  %v259_v21 = vld [vmem:[#allocation7 + $0x580] sm:$0xff]  ;;  %v1891_v30 = vpack.c.bf16 %v641_v23, %v635_v19  ;;  %v118_v6 = vld [vmem:[#allocation7 + $0x118] sm:$0xff]  ;;  %v301_v10 = vld [vmem:[#allocation7 + $0x6d0] sm:$0xff] }
  0xb2   :  { %1920 = vmatpush1.bf16.msra.mxu1 %v1919_v32  ;;  %v593_v32 = vld [vmem:[#allocation7 + $0xff0] sm:$0xff]  ;;  %v1955_v29 = vpack.c.bf16 %v259_v21, %v253_v20  ;;  %v130_v19 = vld [vmem:[#allocation7 + $0x178] sm:$0xff]  ;;  %v319_v23 = vld [vmem:[#allocation7 + $0x760] sm:$0xff] }
  0xb3   :  { %1856 = vmatpush1.bf16.msra.mxu0 %v1855_v36  ;;  %1922 = vmatprep.subr.bf16.mxu1 %v1921_v37  ;;  %v224_v36 = vld [vmem:[#allocation7 + $0x468] sm:$0xff] }
  0xb4   :  { %1858 = vmatprep.subr.bf16.mxu0 %v1857_v42  ;;  %v600_v37 = vld [vmem:[#allocation7 + $0x1028] sm:$0xff]  ;;  %v1875_v42 = vpack.c.bf16 %v593_v32, %v587_v28  ;;  %v1941_v43 = vpack.c.bf16 %v224_v36, %v218_v35  ;;  %v654_v28 = vld [vmem:[#allocation7 + $0x11d8] sm:$0xff]  ;;  %v647_v32 = vld [vmem:[#allocation7 + $0x11a0] sm:$0xff] }
  0xb5   :  { %v1877_v48 = vpack.c.bf16 %v606_v38, %v600_v37  ;;  %v265_v35 = vld [vmem:[#allocation7 + $0x5b0] sm:$0xff]  ;;  %v271_v36 = vld [vmem:[#allocation7 + $0x5e0] sm:$0xff] }
  0xb6   :  { %1924 = vmatpush1.bf16.msra.mxu1 %v1923_v50  ;;  %v230_v50 = vld [vmem:[#allocation7 + $0x498] sm:$0xff]  ;;  %v653_v38 = vld [vmem:[#allocation7 + $0x11d0] sm:$0xff]  ;;  %v1959_v45 = vpack.c.bf16 %v271_v36, %v265_v35 }
  0xb7   :  { %1860 = vmatpush1.bf16.msra.mxu0 %v1859_v51  ;;  %1926 = vmatprep.subr.bf16.mxu1 %v1925_v52  ;;  %v236_v51 = vld [vmem:[#allocation7 + $0x4c8] sm:$0xff]  ;;  %v1895_v47 = vpack.c.bf16 %v653_v38, %v647_v32  ;;  %v659_v32 = vld [vmem:[#allocation5] sm:$0x3]  ;;  %v331_v38 = vld [vmem:[#allocation7 + $0x7c0] sm:$0xff] }
  0xb8   :  { %1862 = vmatprep.subr.bf16.mxu0 %v1861_v56  ;;  %v612_v52 = vld [vmem:[#allocation7 + $0x1088] sm:$0xff]  ;;  %v1945_v56 = vpack.c.bf16 %v236_v51, %v230_v50  ;;  %v283_v50 = vld [vmem:[#allocation7 + $0x640] sm:$0xff]  ;;  %665 = vperm.xlu0 %2312, %v659_v32  }
  0xb9   :  { %v1881_v60 = vpack.c.bf16 %v618_v53, %v612_v52  ;;  %v87_v51 = vld [vmem:[#allocation7 + $0x20] sm:$0xff]  ;;  %v93_v53 = vld [vmem:[#allocation7 + $0x50] sm:$0xff]  ;;  %v1963_v58 = vpack.c.bf16 %v283_v50, %v277_v49  ;;  %1474 = vperm.xlu1 %2314, %v659_v32   ;;  %v2469_v50 = vmov 1  }
  0xba   :  { %1928 = vmatpush1.bf16.msra.mxu1 %v1927_v63  ;;  %v242_v63 = vld [vmem:[#allocation7 + $0x4f8] sm:$0xff]  ;;  %v2091_v59 = vpack.c.bf16 %v93_v53, %v87_v51  ;;  %v337_v53 = vld [vmem:[#allocation7 + $0x7f0] sm:$0xff] }
  0xbb   :  { %1864 = vmatpush1.bf16.msra.mxu0 %v1863_v0  ;;  %1930 = vmatprep.subr.bf16.mxu1 %v1929_v1  ;;  %v248_v0 = vld [vmem:[#allocation7 + $0x528] sm:$0xff] }
  0xbc   :  { %1866 = vmatprep.subr.bf16.mxu0 %v1865_v5  ;;  %v624_v1 = vld [vmem:[#allocation7 + $0x10e8] sm:$0xff]  ;;  %v1949_v5 = vpack.c.bf16 %v248_v0, %v242_v63  ;;  %v295_v63 = vld [vmem:[#allocation7 + $0x6a0] sm:$0xff]  ;;  %2313 = vset.pattern.permute.xlu0 %v2469_v50 }
  0xbd   :  { %v1885_v9 = vpack.c.bf16 %v630_v2, %v624_v1  ;;  %v99_v0 = vld [vmem:[#allocation7 + $0x80] sm:$0xff]  ;;  %v105_v2 = vld [vmem:[#allocation7 + $0xb0] sm:$0xff]  ;;  %v1967_v7 = vpack.c.bf16 %v295_v63, %v289_v62  ;;  %1404 = vperm.xlu0 %2313, %v659_v32   ;;  %v166_v62 = vld [vmem:[#allocation7 + $0x298] sm:$0xff]  ;;  %v2470_v63 = vmov 3  }
  0xbe   :  { %1932 = vmatpush1.bf16.msra.mxu1 %v1931_v12  ;;  %v254_v12 = vld [vmem:[#allocation7 + $0x558] sm:$0xff]  ;;  %v2095_v8 = vpack.c.bf16 %v105_v2, %v99_v0  ;;  %2315 = vset.pattern.permute.xlu1 %v2470_v63  ;;  %v404_v50 = vld [vmem:[#allocation7 + $0xa08] sm:$0xff] }
  0xbf   :  { %1868 = vmatpush1.bf16.msra.mxu0 %v1867_v13  ;;  %1934 = vmatprep.subr.bf16.mxu1 %v1933_v14  ;;  %v260_v13 = vld [vmem:[#allocation7 + $0x588] sm:$0xff] }
  0xc0   :  { %1870 = vmatprep.subr.bf16.mxu0 %v1869_v18  ;;  %v636_v14 = vld [vmem:[#allocation7 + $0x1148] sm:$0xff]  ;;  %v1953_v18 = vpack.c.bf16 %v260_v13, %v254_v12  ;;  %v307_v12 = vld [vmem:[#allocation7 + $0x700] sm:$0xff]  ;;  %1544 = vperm.xlu1 %2315, %v659_v32   ;;  %v189_v32 = vld [vmem:[#allocation7 + $0x350] sm:$0xff] }
  0xc1   :  { %v1889_v22 = vpack.c.bf16 %v642_v15, %v636_v14  ;;  %v111_v13 = vld [vmem:[#allocation7 + $0xe0] sm:$0xff]  ;;  %v117_v15 = vld [vmem:[#allocation7 + $0x110] sm:$0xff]  ;;  %2316 = vset.pattern.permute.xlu0 %v2470_v63  ;;  %v416_v63 = vld [vmem:[#allocation7 + $0xa68] sm:$0xff] }
  0xc2   :  { %1936 = vmatpush1.bf16.msra.mxu1 %v1935_v24  ;;  %v266_v24 = vld [vmem:[#allocation7 + $0x5b8] sm:$0xff]  ;;  %v2099_v20 = vpack.c.bf16 %v117_v15, %v111_v13 }
  0xc3   :  { %1872 = vmatpush1.bf16.msra.mxu0 %v1871_v26  ;;  %1938 = vmatprep.subr.bf16.mxu1 %v1937_v27  ;;  %v272_v26 = vld [vmem:[#allocation7 + $0x5e8] sm:$0xff] }
  0xc4   :  { %1874 = vmatprep.subr.bf16.mxu0 %v1873_v31  ;;  %v648_v27 = vld [vmem:[#allocation7 + $0x11a8] sm:$0xff]  ;;  %v1957_v31 = vpack.c.bf16 %v272_v26, %v266_v24  ;;  %v123_v24 = vld [vmem:[#allocation7 + $0x140] sm:$0xff] }
  0xc5   :  { %v1893_v37 = vpack.c.bf16 %v654_v28, %v648_v27  ;;  %v129_v27 = vld [vmem:[#allocation7 + $0x170] sm:$0xff]  ;;  %v326_v28 = vld [vmem:[#allocation7 + $0x798] sm:$0xff] }
  0xc6   :  { %1940 = vmatpush1.bf16.msra.mxu1 %v1939_v39  ;;  %v278_v39 = vld [vmem:[#allocation7 + $0x618] sm:$0xff] }
  0xc7   :  { %1876 = vmatpush1.bf16.msra.mxu0 %v1875_v42  ;;  %1942 = vmatprep.subr.bf16.mxu1 %v1941_v43  ;;  %v284_v42 = vld [vmem:[#allocation7 + $0x648] sm:$0xff] }
  0xc8   :  { %1878 = vmatprep.subr.bf16.mxu0 %v1877_v48  ;;  %v88_v43 = vld [vmem:[#allocation7 + $0x28] sm:$0xff]  ;;  %v1961_v48 = vpack.c.bf16 %v284_v42, %v278_v39  ;;  %v135_v39 = vld [vmem:[#allocation7 + $0x1a0] sm:$0xff] }
  0xc9   :  { %v2089_v52 = vpack.c.bf16 %v94_v44, %v88_v43  ;;  %v141_v43 = vld [vmem:[#allocation7 + $0x1d0] sm:$0xff]  ;;  %v338_v44 = vld [vmem:[#allocation7 + $0x7f8] sm:$0xff] }
  0xca   :  { %1944 = vmatpush1.bf16.msra.mxu1 %v1943_v54  ;;  %v290_v54 = vld [vmem:[#allocation7 + $0x678] sm:$0xff]  ;;  %v2107_v51 = vpack.c.bf16 %v141_v43, %v135_v39  ;;  %v385_v43 = vld [vmem:[#allocation7 + $0x970] sm:$0xff] }
  0xcb   :  { %1880 = vmatpush1.bf16.msra.mxu0 %v1879_v55  ;;  %1946 = vmatprep.subr.bf16.mxu1 %v1945_v56  ;;  %v296_v55 = vld [vmem:[#allocation7 + $0x6a8] sm:$0xff] }
  0xcc   :  { %1882 = vmatprep.subr.bf16.mxu0 %v1881_v60  ;;  %v100_v56 = vld [vmem:[#allocation7 + $0x88] sm:$0xff]  ;;  %v1965_v60 = vpack.c.bf16 %v296_v55, %v290_v54  ;;  %v343_v54 = vld [vmem:[#allocation7 + $0x820] sm:$0xff] }
  0xcd   :  { %v2093_v1 = vpack.c.bf16 %v106_v57, %v100_v56  ;;  %v147_v55 = vld [vmem:[#allocation7 + $0x200] sm:$0xff]  ;;  %v153_v57 = vld [vmem:[#allocation7 + $0x230] sm:$0xff]  ;;  %v1983_v0 = vpack.c.bf16 %v343_v54, %v337_v53 }
  0xce   :  { %1948 = vmatpush1.bf16.msra.mxu1 %v1947_v3  ;;  %v302_v3 = vld [vmem:[#allocation7 + $0x6d8] sm:$0xff] }
  0xcf   :  { %1884 = vmatpush1.bf16.msra.mxu0 %v1883_v4  ;;  %1950 = vmatprep.subr.bf16.mxu1 %v1949_v5  ;;  %v308_v4 = vld [vmem:[#allocation7 + $0x708] sm:$0xff] }
  0xd0   :  { %1886 = vmatprep.subr.bf16.mxu0 %v1885_v9  ;;  %v112_v5 = vld [vmem:[#allocation7 + $0xe8] sm:$0xff]  ;;  %v1969_v9 = vpack.c.bf16 %v308_v4, %v302_v3  ;;  %v349_v3 = vld [vmem:[#allocation7 + $0x850] sm:$0xff]  ;;  %v355_v4 = vld [vmem:[#allocation7 + $0x880] sm:$0xff] }
  0xd1   :  { %v2097_v14 = vpack.c.bf16 %v118_v6, %v112_v5  ;;  %v159_v5 = vld [vmem:[#allocation7 + $0x260] sm:$0xff]  ;;  %v1987_v13 = vpack.c.bf16 %v355_v4, %v349_v3 }
  0xd2   :  { %1952 = vmatpush1.bf16.msra.mxu1 %v1951_v16  ;;  %v314_v16 = vld [vmem:[#allocation7 + $0x738] sm:$0xff] }
  0xd3   :  { %1888 = vmatpush1.bf16.msra.mxu0 %v1887_v17  ;;  %1954 = vmatprep.subr.bf16.mxu1 %v1953_v18  ;;  %v320_v17 = vld [vmem:[#allocation7 + $0x768] sm:$0xff] }
  0xd4   :  { %1890 = vmatprep.subr.bf16.mxu0 %v1889_v22  ;;  %v124_v18 = vld [vmem:[#allocation7 + $0x148] sm:$0xff]  ;;  %v1973_v21 = vpack.c.bf16 %v320_v17, %v314_v16  ;;  %v313_v22 = vld [vmem:[#allocation7 + $0x730] sm:$0xff]  ;;  %v367_v17 = vld [vmem:[#allocation7 + $0x8e0] sm:$0xff] }
  0xd5   :  { %v2101_v26 = vpack.c.bf16 %v130_v19, %v124_v18  ;;  %v1975_v35 = vpack.c.bf16 %v319_v23, %v313_v22  ;;  %v361_v16 = vld [vmem:[#allocation7 + $0x8b0] sm:$0xff]  ;;  %v171_v18 = vld [vmem:[#allocation7 + $0x2c0] sm:$0xff]  ;;  %v184_v22 = vld [vmem:[#allocation7 + $0x328] sm:$0xff] }
  0xd6   :  { %1956 = vmatpush1.bf16.msra.mxu1 %v1955_v29  ;;  %v332_v29 = vld [vmem:[#allocation7 + $0x7c8] sm:$0xff]  ;;  %v190_v23 = vld [vmem:[#allocation7 + $0x358] sm:$0xff] }
  0xd7   :  { %1892 = vmatpush1.bf16.msra.mxu0 %v1891_v30  ;;  %1958 = vmatprep.subr.bf16.mxu1 %v1957_v31  ;;  %v136_v30 = vld [vmem:[#allocation7 + $0x1a8] sm:$0xff]  ;;  %v142_v31 = vld [vmem:[#allocation7 + $0x1d8] sm:$0xff]  ;;  %v1977_v36 = vpack.c.bf16 %v332_v29, %v326_v28  ;;  %v373_v28 = vld [vmem:[#allocation7 + $0x910] sm:$0xff] }
  0xd8   :  { %1894 = vmatprep.subr.bf16.mxu0 %v1893_v37  ;;  %v325_v37 = vld [vmem:[#allocation7 + $0x790] sm:$0xff]  ;;  %v2105_v42 = vpack.c.bf16 %v142_v31, %v136_v30  ;;  %v379_v29 = vld [vmem:[#allocation7 + $0x940] sm:$0xff]  ;;  %v2121_v31 = vpack.c.bf16 %v190_v23, %v184_v22  ;;  %v434_v22 = vld [vmem:[#allocation7 + $0xaf8] sm:$0xff] }
  0xd9   :  { %v1979_v49 = vpack.c.bf16 %v331_v38, %v325_v37  ;;  %v183_v30 = vld [vmem:[#allocation7 + $0x320] sm:$0xff]  ;;  %v202_v37 = vld [vmem:[#allocation7 + $0x3b8] sm:$0xff]  ;;  %v1995_v38 = vpack.c.bf16 %v379_v29, %v373_v28  ;;  %v440_v23 = vld [vmem:[#allocation7 + $0xb28] sm:$0xff] }
  0xda   :  { %1960 = vmatpush1.bf16.msra.mxu1 %v1959_v45  ;;  %v344_v45 = vld [vmem:[#allocation7 + $0x828] sm:$0xff]  ;;  %v2123_v39 = vpack.c.bf16 %v189_v32, %v183_v30  ;;  %v2013_v29 = vpack.c.bf16 %v440_v23, %v434_v22  ;;  %v433_v30 = vld [vmem:[#allocation7 + $0xaf0] sm:$0xff]  ;;  %v243_v32 = vld [vmem:[#allocation7 + $0x500] sm:$0xff] }
  0xdb   :  { %1896 = vmatpush1.bf16.msra.mxu0 %v1895_v47  ;;  %1962 = vmatprep.subr.bf16.mxu1 %v1961_v48  ;;  %v148_v47 = vld [vmem:[#allocation7 + $0x208] sm:$0xff]  ;;  %v154_v48 = vld [vmem:[#allocation7 + $0x238] sm:$0xff]  ;;  %v297_v23 = vld [vmem:[#allocation7 + $0x6b0] sm:$0xff] }
  0xdc   :  { %2090 = vmatprep.subr.bf16.mxu0 %v2089_v52  ;;  %v1981_v52 = vpack.c.bf16 %v344_v45, %v338_v44  ;;  %v2109_v56 = vpack.c.bf16 %v154_v48, %v148_v47  ;;  %v391_v44 = vld [vmem:[#allocation7 + $0x9a0] sm:$0xff]  ;;  %v201_v48 = vld [vmem:[#allocation7 + $0x3b0] sm:$0xff] }
  0xdd   :  { %1042 = vmatmul.mubr.f32.vlgmr.msra.gmra.mrb[2].mxu1 %v2575_v25  ;;  %v195_v45 = vld [vmem:[#allocation7 + $0x380] sm:$0xff]  ;;  %v1999_v53 = vpack.c.bf16 %v391_v44, %v385_v43 }
  0xde   :  { %971 = vmatmul.mubr.f32.vlgmr.msra.gmra.mrb[0].mxu0 %v2593_v40  ;;  %1964 = vmatpush1.bf16.msra.mxu1 %v1963_v58  ;;  %v1971_v40 = vpack.c.bf16 %v307_v12, %v301_v10  ;;  %v350_v58 = vld [vmem:[#allocation7 + $0x858] sm:$0xff]  ;;  %v172_v10 = vld [vmem:[#allocation7 + $0x2c8] sm:$0xff]  ;;  %v2127_v54 = vpack.c.bf16 %v201_v48, %v195_v45  ;;  %v445_v45 = vld [vmem:[#allocation7 + $0xb50] sm:$0xff] }
  0xdf   :  { %2092 = vmatpush1.bf16.msra.mxu0 %v2091_v59  ;;  %1966 = vmatprep.subr.bf16.mxu1 %v1965_v60  ;;  %v356_v59 = vld [vmem:[#allocation7 + $0x888] sm:$0xff]  ;;  %v178_v12 = vld [vmem:[#allocation7 + $0x2f8] sm:$0xff]  ;;  %v255_v48 = vld [vmem:[#allocation7 + $0x560] sm:$0xff] }
  0xe0   :  { %2094 = vmatprep.subr.bf16.mxu0 %v2093_v1  ;;  %1112 = vmatprep.mubr.f32.mxu1 %v2587_v41  ;;  %v160_v60 = vld [vmem:[#allocation7 + $0x268] sm:$0xff]  ;;  %v2111_v1 = vpack.c.bf16 %v153_v57, %v147_v55  ;;  %v1985_v2 = vpack.c.bf16 %v356_v59, %v350_v58  ;;  %v2117_v19 = vpack.c.bf16 %v178_v12, %v172_v10  ;;  %v403_v57 = vld [vmem:[#allocation7 + $0xa00] sm:$0xff]  ;;  %v422_v10 = vld [vmem:[#allocation7 + $0xa98] sm:$0xff] }
  0xe1   :  { %1254 = vmatprep.mubr.f32.mxu0 %v2579_v33  ;;  %v2103_v33 = vpack.c.bf16 %v129_v27, %v123_v24  ;;  %v2113_v6 = vpack.c.bf16 %v166_v62, %v160_v60  ;;  %v1991_v24 = vpack.c.bf16 %v367_v17, %v361_v16  ;;  %v207_v58 = vld [vmem:[#allocation7 + $0x3e0] sm:$0xff]  ;;  %v213_v60 = vld [vmem:[#allocation7 + $0x410] sm:$0xff]  ;;  %v410_v62 = vld [vmem:[#allocation7 + $0xa38] sm:$0xff] }
  0xe2   :  { %1968 = vmatpush1.bf16.msra.mxu1 %v1967_v7  ;;  %v165_v7 = vld [vmem:[#allocation7 + $0x290] sm:$0xff]  ;;  %v2131_v3 = vpack.c.bf16 %v213_v60, %v207_v58  ;;  %v2005_v4 = vpack.c.bf16 %v416_v63, %v410_v62  ;;  %v428_v12 = vld [vmem:[#allocation7 + $0xac8] sm:$0xff]  ;;  %v267_v60 = vld [vmem:[#allocation7 + $0x5c0] sm:$0xff] }
  0xe3   :  { %2096 = vmatpush1.bf16.msra.mxu0 %v2095_v8  ;;  %1970 = vmatprep.subr.bf16.mxu1 %v1969_v9  ;;  %v362_v8 = vld [vmem:[#allocation7 + $0x8b8] sm:$0xff]  ;;  %v368_v9 = vld [vmem:[#allocation7 + $0x8e8] sm:$0xff]  ;;  %v2009_v17 = vpack.c.bf16 %v428_v12, %v422_v10  ;;  %v457_v58 = vld [vmem:[#allocation7 + $0xbb0] sm:$0xff] }
  0xe4   :  { %2098 = vmatprep.subr.bf16.mxu0 %v2097_v14  ;;  %v2115_v14 = vpack.c.bf16 %v165_v7, %v159_v5  ;;  %v1989_v15 = vpack.c.bf16 %v368_v9, %v362_v8  ;;  %v409_v5 = vld [vmem:[#allocation7 + $0xa30] sm:$0xff]  ;;  %v219_v7 = vld [vmem:[#allocation7 + $0x440] sm:$0xff] }
  0xe5   :  { %v225_v9 = vld [vmem:[#allocation7 + $0x470] sm:$0xff] }
  0xe6   :  { %1972 = vmatpush1.bf16.msra.mxu1 %v1971_v40  ;;  %v177_v40 = vld [vmem:[#allocation7 + $0x2f0] sm:$0xff]  ;;  %v2135_v16 = vpack.c.bf16 %v225_v9, %v219_v7  ;;  %v279_v9 = vld [vmem:[#allocation7 + $0x620] sm:$0xff] }
  0xe7   :  { %2100 = vmatpush1.bf16.msra.mxu0 %v2099_v20  ;;  %1974 = vmatprep.subr.bf16.mxu1 %v1973_v21  ;;  %v374_v20 = vld [vmem:[#allocation7 + $0x918] sm:$0xff]  ;;  %v380_v21 = vld [vmem:[#allocation7 + $0x948] sm:$0xff]  ;;  %v273_v63 = vld [vmem:[#allocation7 + $0x5f0] sm:$0xff] }
  0xe8   :  { %2102 = vmatprep.subr.bf16.mxu0 %v2101_v26  ;;  %v2119_v26 = vpack.c.bf16 %v177_v40, %v171_v18  ;;  %v1993_v27 = vpack.c.bf16 %v380_v21, %v374_v20  ;;  %v421_v18 = vld [vmem:[#allocation7 + $0xa90] sm:$0xff]  ;;  %v231_v40 = vld [vmem:[#allocation7 + $0x4a0] sm:$0xff] }
  0xe9   :  { %v237_v21 = vld [vmem:[#allocation7 + $0x4d0] sm:$0xff] }
  0xea   :  { %1976 = vmatpush1.bf16.msra.mxu1 %v1975_v35  ;;  %v386_v35 = vld [vmem:[#allocation7 + $0x978] sm:$0xff]  ;;  %v2139_v28 = vpack.c.bf16 %v237_v21, %v231_v40  ;;  %v469_v7 = vld [vmem:[#allocation7 + $0xc10] sm:$0xff]  ;;  %v291_v21 = vld [vmem:[#allocation7 + $0x680] sm:$0xff] }
  0xeb   :  { %2104 = vmatpush1.bf16.msra.mxu0 %v2103_v33  ;;  %1978 = vmatprep.subr.bf16.mxu1 %v1977_v36  ;;  %v392_v33 = vld [vmem:[#allocation7 + $0x9a8] sm:$0xff]  ;;  %v285_v12 = vld [vmem:[#allocation7 + $0x650] sm:$0xff] }
  0xec   :  { %2106 = vmatprep.subr.bf16.mxu0 %v2105_v42  ;;  %v196_v36 = vld [vmem:[#allocation7 + $0x388] sm:$0xff]  ;;  %v1997_v42 = vpack.c.bf16 %v392_v33, %v386_v35  ;;  %v249_v33 = vld [vmem:[#allocation7 + $0x530] sm:$0xff] }
  0xed   :  { %v2125_v47 = vpack.c.bf16 %v202_v37, %v196_v36  ;;  %v446_v36 = vld [vmem:[#allocation7 + $0xb58] sm:$0xff]  ;;  %v452_v37 = vld [vmem:[#allocation7 + $0xb88] sm:$0xff]  ;;  %v2143_v43 = vpack.c.bf16 %v249_v33, %v243_v32  ;;  %v481_v40 = vld [vmem:[#allocation7 + $0xc70] sm:$0xff] }
  0xee   :  { %1980 = vmatpush1.bf16.msra.mxu1 %v1979_v49  ;;  %v398_v49 = vld [vmem:[#allocation7 + $0x9d8] sm:$0xff]  ;;  %v2017_v44 = vpack.c.bf16 %v452_v37, %v446_v36  ;;  %v493_v32 = vld [vmem:[#allocation7 + $0xcd0] sm:$0xff]  ;;  %v303_v33 = vld [vmem:[#allocation7 + $0x6e0] sm:$0xff] }
  0xef   :  { %2108 = vmatpush1.bf16.msra.mxu0 %v2107_v51  ;;  %1982 = vmatprep.subr.bf16.mxu1 %v1981_v52  ;;  %v208_v51 = vld [vmem:[#allocation7 + $0x3e8] sm:$0xff]  ;;  %v214_v52 = vld [vmem:[#allocation7 + $0x418] sm:$0xff]  ;;  %v2001_v55 = vpack.c.bf16 %v404_v50, %v398_v49  ;;  %v261_v50 = vld [vmem:[#allocation7 + $0x590] sm:$0xff] }
  0xf0   :  { %2110 = vmatprep.subr.bf16.mxu0 %v2109_v56  ;;  %v397_v56 = vld [vmem:[#allocation7 + $0x9d0] sm:$0xff]  ;;  %v2129_v59 = vpack.c.bf16 %v214_v52, %v208_v51  ;;  %v458_v51 = vld [vmem:[#allocation7 + $0xbb8] sm:$0xff]  ;;  %v464_v52 = vld [vmem:[#allocation7 + $0xbe8] sm:$0xff] }
  0xf1   :  { %v309_v37 = vld [vmem:[#allocation7 + $0x710] sm:$0xff] }
  0xf2   :  { %1984 = vmatpush1.bf16.msra.mxu1 %v1983_v0  ;;  %v220_v0 = vld [vmem:[#allocation7 + $0x448] sm:$0xff] }
  0xf3   :  { %2112 = vmatpush1.bf16.msra.mxu0 %v2111_v1  ;;  %1986 = vmatprep.subr.bf16.mxu1 %v1985_v2  ;;  %v226_v1 = vld [vmem:[#allocation7 + $0x478] sm:$0xff]  ;;  %v2003_v2 = vpack.c.bf16 %v403_v57, %v397_v56  ;;  %v2147_v56 = vpack.c.bf16 %v261_v50, %v255_v48  ;;  %v2021_v57 = vpack.c.bf16 %v464_v52, %v458_v51  ;;  %v511_v48 = vld [vmem:[#allocation7 + $0xd60] sm:$0xff]  ;;  %v321_v51 = vld [vmem:[#allocation7 + $0x770] sm:$0xff] }
  0xf4   :  { %2114 = vmatprep.subr.bf16.mxu0 %v2113_v6  ;;  %v415_v6 = vld [vmem:[#allocation7 + $0xa60] sm:$0xff]  ;;  %v2133_v8 = vpack.c.bf16 %v226_v1, %v220_v0  ;;  %v470_v0 = vld [vmem:[#allocation7 + $0xc18] sm:$0xff]  ;;  %v476_v1 = vld [vmem:[#allocation7 + $0xc48] sm:$0xff] }
  0xf5   :  { %v518_v52 = vld [vmem:[#allocation7 + $0xd98] sm:$0xff] }
  0xf6   :  { %1988 = vmatpush1.bf16.msra.mxu1 %v1987_v13  ;;  %v232_v13 = vld [vmem:[#allocation7 + $0x4a8] sm:$0xff] }
  0xf7   :  { %2116 = vmatpush1.bf16.msra.mxu0 %v2115_v14  ;;  %1990 = vmatprep.subr.bf16.mxu1 %v1989_v15  ;;  %v238_v14 = vld [vmem:[#allocation7 + $0x4d8] sm:$0xff]  ;;  %v2007_v15 = vpack.c.bf16 %v415_v6, %v409_v5  ;;  %v2151_v5 = vpack.c.bf16 %v273_v63, %v267_v60  ;;  %v2025_v6 = vpack.c.bf16 %v476_v1, %v470_v0  ;;  %v327_v60 = vld [vmem:[#allocation7 + $0x7a0] sm:$0xff]  ;;  %v333_v63 = vld [vmem:[#allocation7 + $0x7d0] sm:$0xff] }
  0xf8   :  { %2118 = vmatprep.subr.bf16.mxu0 %v2117_v19  ;;  %v427_v19 = vld [vmem:[#allocation7 + $0xac0] sm:$0xff]  ;;  %v2137_v20 = vpack.c.bf16 %v238_v14, %v232_v13  ;;  %v482_v13 = vld [vmem:[#allocation7 + $0xc78] sm:$0xff]  ;;  %v488_v14 = vld [vmem:[#allocation7 + $0xca8] sm:$0xff] }
  0xf9   :  { %v530_v0 = vld [vmem:[#allocation7 + $0xdf8] sm:$0xff]  ;;  %v536_v1 = vld [vmem:[#allocation7 + $0xe28] sm:$0xff] }
  0xfa   :  { %1992 = vmatpush1.bf16.msra.mxu1 %v1991_v24  ;;  %v244_v24 = vld [vmem:[#allocation7 + $0x508] sm:$0xff] }
  0xfb   :  { %2120 = vmatpush1.bf16.msra.mxu0 %v2119_v26  ;;  %1994 = vmatprep.subr.bf16.mxu1 %v1993_v27  ;;  %v250_v26 = vld [vmem:[#allocation7 + $0x538] sm:$0xff]  ;;  %v2011_v27 = vpack.c.bf16 %v427_v19, %v421_v18  ;;  %v2155_v18 = vpack.c.bf16 %v285_v12, %v279_v9  ;;  %v2029_v19 = vpack.c.bf16 %v488_v14, %v482_v13  ;;  %v339_v9 = vld [vmem:[#allocation7 + $0x800] sm:$0xff]  ;;  %v345_v12 = vld [vmem:[#allocation7 + $0x830] sm:$0xff] }
  0xfc   :  { %2122 = vmatprep.subr.bf16.mxu0 %v2121_v31  ;;  %v439_v31 = vld [vmem:[#allocation7 + $0xb20] sm:$0xff]  ;;  %v2141_v35 = vpack.c.bf16 %v250_v26, %v244_v24  ;;  %v494_v24 = vld [vmem:[#allocation7 + $0xcd8] sm:$0xff]  ;;  %v500_v26 = vld [vmem:[#allocation7 + $0xd08] sm:$0xff] }
  0xfd   :  { %v542_v13 = vld [vmem:[#allocation7 + $0xe58] sm:$0xff]  ;;  %v548_v14 = vld [vmem:[#allocation7 + $0xe88] sm:$0xff] }
  0xfe   :  { %1996 = vmatpush1.bf16.msra.mxu1 %v1995_v38  ;;  %v256_v38 = vld [vmem:[#allocation7 + $0x568] sm:$0xff] }
  0xff   :  { %2124 = vmatpush1.bf16.msra.mxu0 %v2123_v39  ;;  %1998 = vmatprep.subr.bf16.mxu1 %v1997_v42  ;;  %v262_v39 = vld [vmem:[#allocation7 + $0x598] sm:$0xff]  ;;  %v2015_v42 = vpack.c.bf16 %v439_v31, %v433_v30  ;;  %v2159_v30 = vpack.c.bf16 %v297_v23, %v291_v21  ;;  %v2033_v31 = vpack.c.bf16 %v500_v26, %v494_v24  ;;  %v351_v21 = vld [vmem:[#allocation7 + $0x860] sm:$0xff]  ;;  %v357_v23 = vld [vmem:[#allocation7 + $0x890] sm:$0xff] }
 0x100   :  { %2126 = vmatprep.subr.bf16.mxu0 %v2125_v47  ;;  %v451_v47 = vld [vmem:[#allocation7 + $0xb80] sm:$0xff]  ;;  %v2145_v49 = vpack.c.bf16 %v262_v39, %v256_v38  ;;  %v506_v38 = vld [vmem:[#allocation7 + $0xd38] sm:$0xff]  ;;  %v512_v39 = vld [vmem:[#allocation7 + $0xd68] sm:$0xff] }
 0x101   :  { %v554_v24 = vld [vmem:[#allocation7 + $0xeb8] sm:$0xff]  ;;  %v560_v26 = vld [vmem:[#allocation7 + $0xee8] sm:$0xff] }
 0x102   :  { %2000 = vmatpush1.bf16.msra.mxu1 %v1999_v53  ;;  %v268_v53 = vld [vmem:[#allocation7 + $0x5c8] sm:$0xff] }
 0x103   :  { %2128 = vmatpush1.bf16.msra.mxu0 %v2127_v54  ;;  %2002 = vmatprep.subr.bf16.mxu1 %v2001_v55  ;;  %v274_v54 = vld [vmem:[#allocation7 + $0x5f8] sm:$0xff]  ;;  %v2019_v55 = vpack.c.bf16 %v451_v47, %v445_v45  ;;  %v2037_v45 = vpack.c.bf16 %v512_v39, %v506_v38  ;;  %v505_v47 = vld [vmem:[#allocation7 + $0xd30] sm:$0xff]  ;;  %v572_v39 = vld [vmem:[#allocation7 + $0xf48] sm:$0xff] }
 0x104   :  { %2130 = vmatprep.subr.bf16.mxu0 %v2129_v59  ;;  %v463_v59 = vld [vmem:[#allocation7 + $0xbe0] sm:$0xff]  ;;  %v2149_v62 = vpack.c.bf16 %v274_v54, %v268_v53  ;;  %v524_v53 = vld [vmem:[#allocation7 + $0xdc8] sm:$0xff]  ;;  %v566_v38 = vld [vmem:[#allocation7 + $0xf18] sm:$0xff] }
 0x105   :  { %v328_v54 = vld [vmem:[#allocation7 + $0x7a8] sm:$0xff] }
 0x106   :  { %2004 = vmatpush1.bf16.msra.mxu1 %v2003_v2  ;;  %v280_v2 = vld [vmem:[#allocation7 + $0x628] sm:$0xff] }
 0x107   :  { %2132 = vmatpush1.bf16.msra.mxu0 %v2131_v3  ;;  %2006 = vmatprep.subr.bf16.mxu1 %v2005_v4  ;;  %v286_v3 = vld [vmem:[#allocation7 + $0x658] sm:$0xff]  ;;  %v2023_v4 = vpack.c.bf16 %v463_v59, %v457_v58  ;;  %v517_v58 = vld [vmem:[#allocation7 + $0xd90] sm:$0xff]  ;;  %v523_v59 = vld [vmem:[#allocation7 + $0xdc0] sm:$0xff] }
 0x108   :  { %2134 = vmatprep.subr.bf16.mxu0 %v2133_v8  ;;  %v475_v8 = vld [vmem:[#allocation7 + $0xc40] sm:$0xff]  ;;  %v2153_v10 = vpack.c.bf16 %v286_v3, %v280_v2  ;;  %v340_v2 = vld [vmem:[#allocation7 + $0x808] sm:$0xff]  ;;  %v346_v3 = vld [vmem:[#allocation7 + $0x838] sm:$0xff] }
 0x10a   :  { %2008 = vmatpush1.bf16.msra.mxu1 %v2007_v15  ;;  %v292_v15 = vld [vmem:[#allocation7 + $0x688] sm:$0xff] }
 0x10b   :  { %2136 = vmatpush1.bf16.msra.mxu0 %v2135_v16  ;;  %2010 = vmatprep.subr.bf16.mxu1 %v2009_v17  ;;  %v298_v16 = vld [vmem:[#allocation7 + $0x6b8] sm:$0xff]  ;;  %v2027_v17 = vpack.c.bf16 %v475_v8, %v469_v7  ;;  %v529_v7 = vld [vmem:[#allocation7 + $0xdf0] sm:$0xff]  ;;  %v535_v8 = vld [vmem:[#allocation7 + $0xe20] sm:$0xff] }
 0x10c   :  { %2138 = vmatprep.subr.bf16.mxu0 %v2137_v20  ;;  %v487_v20 = vld [vmem:[#allocation7 + $0xca0] sm:$0xff]  ;;  %v2157_v22 = vpack.c.bf16 %v298_v16, %v292_v15  ;;  %v352_v15 = vld [vmem:[#allocation7 + $0x868] sm:$0xff]  ;;  %v358_v16 = vld [vmem:[#allocation7 + $0x898] sm:$0xff] }
 0x10e   :  { %2012 = vmatpush1.bf16.msra.mxu1 %v2011_v27  ;;  %v304_v27 = vld [vmem:[#allocation7 + $0x6e8] sm:$0xff] }
 0x10f   :  { %2140 = vmatpush1.bf16.msra.mxu0 %v2139_v28  ;;  %2014 = vmatprep.subr.bf16.mxu1 %v2013_v29  ;;  %v310_v28 = vld [vmem:[#allocation7 + $0x718] sm:$0xff]  ;;  %v2031_v29 = vpack.c.bf16 %v487_v20, %v481_v40  ;;  %v541_v40 = vld [vmem:[#allocation7 + $0xe50] sm:$0xff]  ;;  %v547_v20 = vld [vmem:[#allocation7 + $0xe80] sm:$0xff] }
 0x110   :  { %2142 = vmatprep.subr.bf16.mxu0 %v2141_v35  ;;  %v499_v35 = vld [vmem:[#allocation7 + $0xd00] sm:$0xff]  ;;  %v2161_v36 = vpack.c.bf16 %v310_v28, %v304_v27  ;;  %v364_v27 = vld [vmem:[#allocation7 + $0x8c8] sm:$0xff]  ;;  %v370_v28 = vld [vmem:[#allocation7 + $0x8f8] sm:$0xff] }
 0x112   :  { %2016 = vmatpush1.bf16.msra.mxu1 %v2015_v42  ;;  %v316_v42 = vld [vmem:[#allocation7 + $0x748] sm:$0xff] }
 0x113   :  { %2144 = vmatpush1.bf16.msra.mxu0 %v2143_v43  ;;  %2018 = vmatprep.subr.bf16.mxu1 %v2017_v44  ;;  %v322_v43 = vld [vmem:[#allocation7 + $0x778] sm:$0xff]  ;;  %v2163_v44 = vpack.c.bf16 %v309_v37, %v303_v33  ;;  %v363_v33 = vld [vmem:[#allocation7 + $0x8c0] sm:$0xff]  ;;  %v369_v37 = vld [vmem:[#allocation7 + $0x8f0] sm:$0xff] }
 0x114   :  { %2146 = vmatprep.subr.bf16.mxu0 %v2145_v49  ;;  %v315_v49 = vld [vmem:[#allocation7 + $0x740] sm:$0xff]  ;;  %v2165_v50 = vpack.c.bf16 %v322_v43, %v316_v42  ;;  %v376_v42 = vld [vmem:[#allocation7 + $0x928] sm:$0xff]  ;;  %v382_v43 = vld [vmem:[#allocation7 + $0x958] sm:$0xff] }
 0x116   :  { %2020 = vmatpush1.bf16.msra.mxu1 %v2019_v55  ;;  %v334_v55 = vld [vmem:[#allocation7 + $0x7d8] sm:$0xff] }
 0x117   :  { %2148 = vmatpush1.bf16.msra.mxu0 %v2147_v56  ;;  %2022 = vmatprep.subr.bf16.mxu1 %v2021_v57  ;;  %v2039_v56 = vpack.c.bf16 %v511_v48, %v505_v47  ;;  %v2041_v57 = vpack.c.bf16 %v524_v53, %v518_v52  ;;  %v565_v47 = vld [vmem:[#allocation7 + $0xf10] sm:$0xff]  ;;  %v571_v48 = vld [vmem:[#allocation7 + $0xf40] sm:$0xff]  ;;  %v578_v52 = vld [vmem:[#allocation7 + $0xf78] sm:$0xff] }
 0x118   :  { %2150 = vmatprep.subr.bf16.mxu0 %v2149_v62  ;;  %v2169_v62 = vpack.c.bf16 %v334_v55, %v328_v54  ;;  %v584_v53 = vld [vmem:[#allocation7 + $0xfa8] sm:$0xff]  ;;  %v394_v55 = vld [vmem:[#allocation7 + $0x9b8] sm:$0xff] }
 0x119   :  { %v388_v54 = vld [vmem:[#allocation7 + $0x988] sm:$0xff] }
 0x11a   :  { %2024 = vmatpush1.bf16.msra.mxu1 %v2023_v4  ;;  %v2043_v4 = vpack.c.bf16 %v523_v59, %v517_v58  ;;  %v577_v58 = vld [vmem:[#allocation7 + $0xf70] sm:$0xff]  ;;  %v583_v59 = vld [vmem:[#allocation7 + $0xfa0] sm:$0xff] }
 0x11b   :  { %2152 = vmatpush1.bf16.msra.mxu0 %v2151_v5  ;;  %2026 = vmatprep.subr.bf16.mxu1 %v2025_v6  ;;  %v2171_v5 = vpack.c.bf16 %v333_v63, %v327_v60  ;;  %v2045_v6 = vpack.c.bf16 %v536_v1, %v530_v0  ;;  %v387_v60 = vld [vmem:[#allocation7 + $0x980] sm:$0xff]  ;;  %v393_v63 = vld [vmem:[#allocation7 + $0x9b0] sm:$0xff]  ;;  %v590_v0 = vld [vmem:[#allocation7 + $0xfd8] sm:$0xff] }
 0x11c   :  { %2154 = vmatprep.subr.bf16.mxu0 %v2153_v10  ;;  %v2173_v10 = vpack.c.bf16 %v346_v3, %v340_v2  ;;  %v596_v1 = vld [vmem:[#allocation7 + $0x1008] sm:$0xff]  ;;  %v406_v3 = vld [vmem:[#allocation7 + $0xa18] sm:$0xff] }
 0x11d   :  { %1113 = vmatmul.mubr.f32.vlgmr.msra.gmra.mrb[2].mxu1 %v2582_v34  ;;  %v400_v2 = vld [vmem:[#allocation7 + $0x9e8] sm:$0xff] }
 0x11e   :  { %2028 = vmatpush1.bf16.msra.mxu1 %v2027_v17  ;;  %1255 = vmatmul.mubr.f32.vlgmr.msra.gmra.mrb[2].mxu0 %v2575_v25  ;;  %v2035_v25 = vpack.c.bf16 %v499_v35, %v493_v32  ;;  %v2047_v17 = vpack.c.bf16 %v535_v8, %v529_v7  ;;  %v553_v32 = vld [vmem:[#allocation7 + $0xeb0] sm:$0xff]  ;;  %v559_v35 = vld [vmem:[#allocation7 + $0xee0] sm:$0xff] }
 0x11f   :  { %2156 = vmatpush1.bf16.msra.mxu0 %v2155_v18  ;;  %2030 = vmatprep.subr.bf16.mxu1 %v2029_v19  ;;  %v2175_v18 = vpack.c.bf16 %v345_v12, %v339_v9  ;;  %v2049_v19 = vpack.c.bf16 %v548_v14, %v542_v13  ;;  %v589_v7 = vld [vmem:[#allocation7 + $0xfd0] sm:$0xff]  ;;  %v595_v8 = vld [vmem:[#allocation7 + $0x1000] sm:$0xff]  ;;  %v602_v13 = vld [vmem:[#allocation7 + $0x1038] sm:$0xff] }
 0x120   :  { %2158 = vmatprep.subr.bf16.mxu0 %v2157_v22  ;;  %1183 = vmatprep.mubr.f32.mxu1 %v2597_v46  ;;  %v2177_v22 = vpack.c.bf16 %v358_v16, %v352_v15  ;;  %v399_v9 = vld [vmem:[#allocation7 + $0x9e0] sm:$0xff]  ;;  %v405_v12 = vld [vmem:[#allocation7 + $0xa10] sm:$0xff]  ;;  %v608_v14 = vld [vmem:[#allocation7 + $0x1068] sm:$0xff] }
 0x121   :  { %1325 = vmatprep.mubr.f32.mxu0 %v2587_v41  ;;  %v2167_v41 = vpack.c.bf16 %v321_v51, %v315_v49  ;;  %v375_v49 = vld [vmem:[#allocation7 + $0x920] sm:$0xff]  ;;  %v381_v51 = vld [vmem:[#allocation7 + $0x950] sm:$0xff]  ;;  %v412_v15 = vld [vmem:[#allocation7 + $0xa48] sm:$0xff] }
 0x122   :  { %2032 = vmatpush1.bf16.msra.mxu1 %v2031_v29  ;;  %v2051_v29 = vpack.c.bf16 %v547_v20, %v541_v40  ;;  %v418_v16 = vld [vmem:[#allocation7 + $0xa78] sm:$0xff]  ;;  %v601_v40 = vld [vmem:[#allocation7 + $0x1030] sm:$0xff]  ;;  %v607_v20 = vld [vmem:[#allocation7 + $0x1060] sm:$0xff] }
 0x123   :  { %2160 = vmatpush1.bf16.msra.mxu0 %v2159_v30  ;;  %2034 = vmatprep.subr.bf16.mxu1 %v2033_v31  ;;  %v2179_v30 = vpack.c.bf16 %v357_v23, %v351_v21  ;;  %v2053_v31 = vpack.c.bf16 %v560_v26, %v554_v24  ;;  %v411_v21 = vld [vmem:[#allocation7 + $0xa40] sm:$0xff]  ;;  %v417_v23 = vld [vmem:[#allocation7 + $0xa70] sm:$0xff]  ;;  %v614_v24 = vld [vmem:[#allocation7 + $0x1098] sm:$0xff] }
 0x124   :  { %2162 = vmatprep.subr.bf16.mxu0 %v2161_v36  ;;  %v2181_v36 = vpack.c.bf16 %v370_v28, %v364_v27  ;;  %v620_v26 = vld [vmem:[#allocation7 + $0x10c8] sm:$0xff]  ;;  %v430_v28 = vld [vmem:[#allocation7 + $0xad8] sm:$0xff] }
 0x125   :  { %v424_v27 = vld [vmem:[#allocation7 + $0xaa8] sm:$0xff] }
 0x126   :  { %2036 = vmatpush1.bf16.msra.mxu1 %v2035_v25  ;;  %v2055_v25 = vpack.c.bf16 %v559_v35, %v553_v32  ;;  %v613_v32 = vld [vmem:[#allocation7 + $0x1090] sm:$0xff]  ;;  %v619_v35 = vld [vmem:[#allocation7 + $0x10c0] sm:$0xff] }
 0x127   :  { %2164 = vmatpush1.bf16.msra.mxu0 %v2163_v44  ;;  %2038 = vmatprep.subr.bf16.mxu1 %v2037_v45  ;;  %v2183_v44 = vpack.c.bf16 %v369_v37, %v363_v33  ;;  %v2057_v45 = vpack.c.bf16 %v572_v39, %v566_v38  ;;  %v423_v33 = vld [vmem:[#allocation7 + $0xaa0] sm:$0xff]  ;;  %v429_v37 = vld [vmem:[#allocation7 + $0xad0] sm:$0xff]  ;;  %v626_v38 = vld [vmem:[#allocation7 + $0x10f8] sm:$0xff] }
 0x128   :  { %2166 = vmatprep.subr.bf16.mxu0 %v2165_v50  ;;  %v2185_v50 = vpack.c.bf16 %v382_v43, %v376_v42  ;;  %v632_v39 = vld [vmem:[#allocation7 + $0x1128] sm:$0xff]  ;;  %v442_v43 = vld [vmem:[#allocation7 + $0xb38] sm:$0xff] }
 0x129   :  { %v436_v42 = vld [vmem:[#allocation7 + $0xb08] sm:$0xff] }
 0x12a   :  { %2040 = vmatpush1.bf16.msra.mxu1 %v2039_v56  ;;  %v2059_v56 = vpack.c.bf16 %v571_v48, %v565_v47  ;;  %v625_v47 = vld [vmem:[#allocation7 + $0x10f0] sm:$0xff]  ;;  %v631_v48 = vld [vmem:[#allocation7 + $0x1120] sm:$0xff] }
 0x12b   :  { %2168 = vmatpush1.bf16.msra.mxu0 %v2167_v41  ;;  %2042 = vmatprep.subr.bf16.mxu1 %v2041_v57  ;;  %v2187_v41 = vpack.c.bf16 %v381_v51, %v375_v49  ;;  %v2061_v57 = vpack.c.bf16 %v584_v53, %v578_v52  ;;  %v435_v49 = vld [vmem:[#allocation7 + $0xb00] sm:$0xff]  ;;  %v441_v51 = vld [vmem:[#allocation7 + $0xb30] sm:$0xff]  ;;  %v638_v52 = vld [vmem:[#allocation7 + $0x1158] sm:$0xff] }
 0x12c   :  { %2170 = vmatprep.subr.bf16.mxu0 %v2169_v62  ;;  %v2189_v62 = vpack.c.bf16 %v394_v55, %v388_v54  ;;  %v644_v53 = vld [vmem:[#allocation7 + $0x1188] sm:$0xff]  ;;  %v454_v55 = vld [vmem:[#allocation7 + $0xb98] sm:$0xff] }
 0x12d   :  { %v448_v54 = vld [vmem:[#allocation7 + $0xb68] sm:$0xff] }
 0x12e   :  { %2044 = vmatpush1.bf16.msra.mxu1 %v2043_v4  ;;  %v2063_v4 = vpack.c.bf16 %v583_v59, %v577_v58  ;;  %v637_v58 = vld [vmem:[#allocation7 + $0x1150] sm:$0xff]  ;;  %v643_v59 = vld [vmem:[#allocation7 + $0x1180] sm:$0xff] }
 0x12f   :  { %2172 = vmatpush1.bf16.msra.mxu0 %v2171_v5  ;;  %2046 = vmatprep.subr.bf16.mxu1 %v2045_v6  ;;  %v2191_v5 = vpack.c.bf16 %v393_v63, %v387_v60  ;;  %v2065_v6 = vpack.c.bf16 %v596_v1, %v590_v0  ;;  %v447_v60 = vld [vmem:[#allocation7 + $0xb60] sm:$0xff]  ;;  %v453_v63 = vld [vmem:[#allocation7 + $0xb90] sm:$0xff]  ;;  %v650_v0 = vld [vmem:[#allocation7 + $0x11b8] sm:$0xff] }
 0x130   :  { %2174 = vmatprep.subr.bf16.mxu0 %v2173_v10  ;;  %v2193_v10 = vpack.c.bf16 %v406_v3, %v400_v2  ;;  %v656_v1 = vld [vmem:[#allocation7 + $0x11e8] sm:$0xff]  ;;  %v466_v3 = vld [vmem:[#allocation7 + $0xbf8] sm:$0xff] }
 0x131   :  { %v460_v2 = vld [vmem:[#allocation7 + $0xbc8] sm:$0xff] }
 0x132   :  { %2048 = vmatpush1.bf16.msra.mxu1 %v2047_v17  ;;  %v2067_v17 = vpack.c.bf16 %v595_v8, %v589_v7  ;;  %v649_v7 = vld [vmem:[#allocation7 + $0x11b0] sm:$0xff]  ;;  %v655_v8 = vld [vmem:[#allocation7 + $0x11e0] sm:$0xff] }
 0x133   :  { %2176 = vmatpush1.bf16.msra.mxu0 %v2175_v18  ;;  %2050 = vmatprep.subr.bf16.mxu1 %v2049_v19  ;;  %v2195_v18 = vpack.c.bf16 %v405_v12, %v399_v9  ;;  %v2069_v19 = vpack.c.bf16 %v608_v14, %v602_v13  ;;  %v2213_v9 = vpack.c.bf16 %v466_v3, %v460_v2  ;;  %v465_v12 = vld [vmem:[#allocation7 + $0xbf0] sm:$0xff]  ;;  %v472_v13 = vld [vmem:[#allocation7 + $0xc28] sm:$0xff]  ;;  %v478_v14 = vld [vmem:[#allocation7 + $0xc58] sm:$0xff] }
 0x134   :  { %2178 = vmatprep.subr.bf16.mxu0 %v2177_v22  ;;  %v2197_v22 = vpack.c.bf16 %v418_v16, %v412_v15  ;;  %v2087_v15 = vpack.c.bf16 %v655_v8, %v649_v7  ;;  %v568_v2 = vld [vmem:[#allocation7 + $0xf28] sm:$0xff]  ;;  %v574_v3 = vld [vmem:[#allocation7 + $0xf58] sm:$0xff]  ;;  %v573_v7 = vld [vmem:[#allocation7 + $0xf50] sm:$0xff] }
 0x135   :  { %v580_v8 = vld [vmem:[#allocation7 + $0xf88] sm:$0xff] }
 0x136   :  { %2052 = vmatpush1.bf16.msra.mxu1 %v2051_v29  ;;  %v2071_v29 = vpack.c.bf16 %v607_v20, %v601_v40  ;;  %v484_v40 = vld [vmem:[#allocation7 + $0xc88] sm:$0xff]  ;;  %v490_v20 = vld [vmem:[#allocation7 + $0xcb8] sm:$0xff] }
 0x137   :  { %2180 = vmatpush1.bf16.msra.mxu0 %v2179_v30  ;;  %2054 = vmatprep.subr.bf16.mxu1 %v2053_v31  ;;  %v2199_v30 = vpack.c.bf16 %v417_v23, %v411_v21  ;;  %v2073_v31 = vpack.c.bf16 %v620_v26, %v614_v24  ;;  %v483_v23 = vld [vmem:[#allocation7 + $0xc80] sm:$0xff]  ;;  %v489_v24 = vld [vmem:[#allocation7 + $0xcb0] sm:$0xff]  ;;  %v2608_v26 = vld.sshfl [vmem:[#allocation2 + $0x8] sm:$0x33 pattern:$0x76325410] }
 0x138   :  { %2182 = vmatprep.subr.bf16.mxu0 %v2181_v36  ;;  %v2201_v36 = vpack.c.bf16 %v430_v28, %v424_v27  ;;  %v496_v27 = vld [vmem:[#allocation7 + $0xce8] sm:$0xff]  ;;  %v502_v28 = vld [vmem:[#allocation7 + $0xd18] sm:$0xff] }
 0x13a   :  { %2056 = vmatpush1.bf16.msra.mxu1 %v2055_v25  ;;  %v2075_v25 = vpack.c.bf16 %v619_v35, %v613_v32  ;;  %v501_v32 = vld [vmem:[#allocation7 + $0xd10] sm:$0xff]  ;;  %v508_v35 = vld [vmem:[#allocation7 + $0xd48] sm:$0xff] }
 0x13b   :  { %2184 = vmatpush1.bf16.msra.mxu0 %v2183_v44  ;;  %2058 = vmatprep.subr.bf16.mxu1 %v2057_v45  ;;  %v2203_v44 = vpack.c.bf16 %v429_v37, %v423_v33  ;;  %v2077_v45 = vpack.c.bf16 %v632_v39, %v626_v38  ;;  %v514_v33 = vld [vmem:[#allocation7 + $0xd78] sm:$0xff]  ;;  %v507_v38 = vld [vmem:[#allocation7 + $0xd40] sm:$0xff]  ;;  %v513_v39 = vld [vmem:[#allocation7 + $0xd70] sm:$0xff] }
 0x13c   :  { %2186 = vmatprep.subr.bf16.mxu0 %v2185_v50  ;;  %v2205_v50 = vpack.c.bf16 %v442_v43, %v436_v42  ;;  %v2229_v37 = vpack.c.bf16 %v514_v33, %v508_v35  ;;  %v520_v42 = vld [vmem:[#allocation7 + $0xda8] sm:$0xff]  ;;  %v526_v43 = vld [vmem:[#allocation7 + $0xdd8] sm:$0xff]  ;;  %v621_v35 = vld [vmem:[#allocation7 + $0x10d0] sm:$0xff] }
 0x13d   :  { %v628_v33 = vld [vmem:[#allocation7 + $0x1108] sm:$0xff] }
 0x13e   :  { %2060 = vmatpush1.bf16.msra.mxu1 %v2059_v56  ;;  %v2079_v56 = vpack.c.bf16 %v631_v48, %v625_v47  ;;  %v538_v47 = vld [vmem:[#allocation7 + $0xe38] sm:$0xff] }
 0x13f   :  { %2188 = vmatpush1.bf16.msra.mxu0 %v2187_v41  ;;  %2062 = vmatprep.subr.bf16.mxu1 %v2061_v57  ;;  %v2207_v41 = vpack.c.bf16 %v441_v51, %v435_v49  ;;  %v2081_v57 = vpack.c.bf16 %v644_v53, %v638_v52  ;;  %v537_v51 = vld [vmem:[#allocation7 + $0xe30] sm:$0xff]  ;;  %v544_v52 = vld [vmem:[#allocation7 + $0xe68] sm:$0xff]  ;;  %v550_v53 = vld [vmem:[#allocation7 + $0xe98] sm:$0xff] }
 0x140   :  { %2190 = vmatprep.subr.bf16.mxu0 %v2189_v62  ;;  %v2209_v62 = vpack.c.bf16 %v454_v55, %v448_v54  ;;  %v2241_v55 = vpack.c.bf16 %v550_v53, %v544_v52  ;;  %v657_v52 = vld [vmem:[#allocation7 + $0x11f0] sm:$0xff] }
 0x142   :  { %2064 = vmatpush1.bf16.msra.mxu1 %v2063_v4  ;;  %v2083_v4 = vpack.c.bf16 %v643_v59, %v637_v58  ;;  %v556_v58 = vld [vmem:[#allocation7 + $0xec8] sm:$0xff]  ;;  %v562_v59 = vld [vmem:[#allocation7 + $0xef8] sm:$0xff] }
 0x143   :  { %2192 = vmatpush1.bf16.msra.mxu0 %v2191_v5  ;;  %2066 = vmatprep.subr.bf16.mxu1 %v2065_v6  ;;  %v2211_v5 = vpack.c.bf16 %v453_v63, %v447_v60  ;;  %v2085_v6 = vpack.c.bf16 %v656_v1, %v650_v0  ;;  %v2245_v63 = vpack.c.bf16 %v562_v59, %v556_v58  ;;  %v555_v0 = vld [vmem:[#allocation7 + $0xec0] sm:$0xff]  ;;  %v561_v1 = vld [vmem:[#allocation7 + $0xef0] sm:$0xff]  ;;  %v2626_v58 = vsub.s32 1, %v2569_v61 }
 0x144   :  { %2194 = vmatprep.subr.bf16.mxu0 %v2193_v10  ;;  %v459_v10 = vld [vmem:[#allocation7 + $0xbc0] sm:$0xff] }
 0x145   :  { %v2215_v16 = vpack.c.bf16 %v465_v12, %v459_v10 }
 0x146   :  { %2068 = vmatpush1.bf16.msra.mxu1 %v2067_v17  ;;  %v2217_v17 = vpack.c.bf16 %v478_v14, %v472_v13  ;;  %v579_v13 = vld [vmem:[#allocation7 + $0xf80] sm:$0xff]  ;;  %v585_v14 = vld [vmem:[#allocation7 + $0xfb0] sm:$0xff] }
 0x147   :  { %2196 = vmatpush1.bf16.msra.mxu0 %v2195_v18  ;;  %2070 = vmatprep.subr.bf16.mxu1 %v2069_v19  ;;  %v471_v18 = vld [vmem:[#allocation7 + $0xc20] sm:$0xff]  ;;  %v477_v19 = vld [vmem:[#allocation7 + $0xc50] sm:$0xff] }
 0x148   :  { %2198 = vmatprep.subr.bf16.mxu0 %v2197_v22  ;;  %v2219_v21 = vpack.c.bf16 %v477_v19, %v471_v18  ;;  %v2221_v22 = vpack.c.bf16 %v490_v20, %v484_v40  ;;  %v591_v19 = vld [vmem:[#allocation7 + $0xfe0] sm:$0xff]  ;;  %v597_v40 = vld [vmem:[#allocation7 + $0x1010] sm:$0xff]  ;;  %v604_v20 = vld [vmem:[#allocation7 + $0x1048] sm:$0xff] }
 0x14a   :  { %2072 = vmatpush1.bf16.msra.mxu1 %v2071_v29  ;;  %v2223_v29 = vpack.c.bf16 %v489_v24, %v483_v23  ;;  %v603_v24 = vld [vmem:[#allocation7 + $0x1040] sm:$0xff] }
 0x14b   :  { %2200 = vmatpush1.bf16.msra.mxu0 %v2199_v30  ;;  %2074 = vmatprep.subr.bf16.mxu1 %v2073_v31  ;;  %v2225_v30 = vpack.c.bf16 %v502_v28, %v496_v27  ;;  %v495_v31 = vld [vmem:[#allocation7 + $0xce0] sm:$0xff]  ;;  %v609_v27 = vld [vmem:[#allocation7 + $0x1070] sm:$0xff]  ;;  %v616_v28 = vld [vmem:[#allocation7 + $0x10a8] sm:$0xff] }
 0x14c   :  { %2202 = vmatprep.subr.bf16.mxu0 %v2201_v36  ;;  %v2227_v36 = vpack.c.bf16 %v501_v32, %v495_v31  ;;  %v615_v32 = vld [vmem:[#allocation7 + $0x10a0] sm:$0xff] }
 0x14e   :  { %2076 = vmatpush1.bf16.msra.mxu1 %v2075_v25  ;;  %v2233_v25 = vpack.c.bf16 %v526_v43, %v520_v42  ;;  %v633_v42 = vld [vmem:[#allocation7 + $0x1130] sm:$0xff]  ;;  %v640_v43 = vld [vmem:[#allocation7 + $0x1168] sm:$0xff] }
 0x14f   :  { %2204 = vmatpush1.bf16.msra.mxu0 %v2203_v44  ;;  %2078 = vmatprep.subr.bf16.mxu1 %v2077_v45  ;;  %v519_v44 = vld [vmem:[#allocation7 + $0xda0] sm:$0xff]  ;;  %v532_v45 = vld [vmem:[#allocation7 + $0xe08] sm:$0xff] }
 0x150   :  { %2206 = vmatprep.subr.bf16.mxu0 %v2205_v50  ;;  %v2237_v49 = vpack.c.bf16 %v538_v47, %v532_v45  ;;  %v531_v50 = vld [vmem:[#allocation7 + $0xe00] sm:$0xff]  ;;  %v645_v45 = vld [vmem:[#allocation7 + $0x1190] sm:$0xff]  ;;  %v652_v47 = vld [vmem:[#allocation7 + $0x11c8] sm:$0xff] }
 0x151   :  { %v2239_v54 = vpack.c.bf16 %v537_v51, %v531_v50  ;;  %v651_v51 = vld [vmem:[#allocation7 + $0x11c0] sm:$0xff] }
 0x152   :  { %2080 = vmatpush1.bf16.msra.mxu1 %v2079_v56  ;;  %v543_v56 = vld [vmem:[#allocation7 + $0xe60] sm:$0xff]  ;;  %v2279_v53 = vpack.c.bf16 %v657_v52, %v651_v51 }
 0x153   :  { %2208 = vmatpush1.bf16.msra.mxu0 %v2207_v41  ;;  %2082 = vmatprep.subr.bf16.mxu1 %v2081_v57  ;;  %v549_v41 = vld [vmem:[#allocation7 + $0xe90] sm:$0xff] }
 0x154   :  { %2210 = vmatprep.subr.bf16.mxu0 %v2209_v62  ;;  %v2243_v62 = vpack.c.bf16 %v549_v41, %v543_v56  ;;  %v2622_v56 = vsub.s32 4, %v2569_v61 }
 0x156   :  { %2084 = vmatpush1.bf16.msra.mxu1 %v2083_v4  ;;  %v2247_v4 = vpack.c.bf16 %v561_v1, %v555_v0  ;;  %v2636_v0 = vpop.permute.xlu0 %665  ;;  %v2639_v1 = vsub.s32 6, %v2569_v61 }
 0x157   :  { %2212 = vmatpush1.bf16.msra.mxu0 %v2211_v5  ;;  %2086 = vmatprep.subr.bf16.mxu1 %v2085_v6  ;;  %v2249_v5 = vpack.c.bf16 %v574_v3, %v568_v2  ;;  %v567_v6 = vld [vmem:[#allocation7 + $0xf20] sm:$0xff]  ;;  %v2643_v3 = vsub.s32 3, %v2569_v61 }
 0x158   :  { %2214 = vmatprep.subr.bf16.mxu0 %v2213_v9  ;;  %v586_v9 = vld [vmem:[#allocation7 + $0xfb8] sm:$0xff]  ;;  %v2251_v10 = vpack.c.bf16 %v573_v7, %v567_v6  ;;  %v2648_v6 = vsub.s32 7, %v2569_v61 }
 0x159   :  { %v2253_v12 = vpack.c.bf16 %v586_v9, %v580_v8  ;;  %v2652_v9 = vpop.permute.xlu1 %1474 }
 0x15a   :  { %2088 = vmatpush1.bf16.msra.mxu1 %v2087_v15  ;;  %v592_v15 = vld [vmem:[#allocation7 + $0xfe8] sm:$0xff] }
 0x15b   :  { %2216 = vmatpush1.bf16.msra.mxu0 %v2215_v16  ;;  %v598_v16 = vld [vmem:[#allocation7 + $0x1018] sm:$0xff] }
 0x15c   :  { %2218 = vmatprep.subr.bf16.mxu0 %v2217_v17  ;;  %v2255_v17 = vpack.c.bf16 %v585_v14, %v579_v13  ;;  %v2257_v18 = vpack.c.bf16 %v598_v16, %v592_v15  ;;  %v2658_v15 = vpop.permute.xlu0 %1404 }
 0x15d   :  { %1184 = vmatmul.mubr.f32.vlgmr.msra.gmra.mrb[2].mxu1 %v2608_v26 }
 0x15e   :  { %1326 = vmatmul.mubr.f32.vlgmr.msra.gmra.mrb[2].mxu0 %v2582_v34  ;;  %v2231_v34 = vpack.c.bf16 %v513_v39, %v507_v38  ;;  %v627_v39 = vld [vmem:[#allocation7 + $0x1100] sm:$0xff] }
 0x15f   :  { %2220 = vmatpush1.bf16.msra.mxu0 %v2219_v21  ;;  %1396 = vmatprep.mubr.f32.mxu0 %v2597_v46  ;;  %v525_v46 = vld [vmem:[#allocation7 + $0xdd0] sm:$0xff]  ;;  %v610_v21 = vld [vmem:[#allocation7 + $0x1078] sm:$0xff] }
 0x160   :  { %2222 = vmatprep.subr.bf16.mxu0 %v2221_v22  ;;  %v2235_v48 = vpack.c.bf16 %v525_v46, %v519_v44  ;;  %v2259_v22 = vpack.c.bf16 %v597_v40, %v591_v19  ;;  %v2261_v23 = vpack.c.bf16 %v610_v21, %v604_v20  ;;  %v639_v46 = vld [vmem:[#allocation7 + $0x1160] sm:$0xff] }
 0x163   :  { %2224 = vmatpush1.bf16.msra.mxu0 %v2223_v29  ;;  %v622_v29 = vld [vmem:[#allocation7 + $0x10d8] sm:$0xff] }
 0x164   :  { %2226 = vmatprep.subr.bf16.mxu0 %v2225_v30  ;;  %v2263_v30 = vpack.c.bf16 %v609_v27, %v603_v24  ;;  %v2265_v31 = vpack.c.bf16 %v622_v29, %v616_v28  ;;  %v2670_v27 = vpop.permute.xlu1 %1544 }
 0x167   :  { %2228 = vmatpush1.bf16.msra.mxu0 %v2227_v36  ;;  %v634_v36 = vld [vmem:[#allocation7 + $0x1138] sm:$0xff] }
 0x168   :  { %2230 = vmatprep.subr.bf16.mxu0 %v2229_v37  ;;  %v2267_v37 = vpack.c.bf16 %v621_v35, %v615_v32  ;;  %v2269_v38 = vpack.c.bf16 %v634_v36, %v628_v33  ;;  %v2674_v32 = vld [vmem:[#allocation10] sm:$0x3f] }
 0x16b   :  { %2232 = vmatpush1.bf16.msra.mxu0 %v2231_v34  ;;  %v646_v34 = vld [vmem:[#allocation7 + $0x1198] sm:$0xff] }
 0x16c   :  { %2234 = vmatprep.subr.bf16.mxu0 %v2233_v25  ;;  %v2271_v25 = vpack.c.bf16 %v633_v42, %v627_v39  ;;  %v2273_v44 = vpack.c.bf16 %v646_v34, %v640_v43  ;;  %v1622_v42 = vrot.slane %v2674_v32, %v2626_v58 }
 0x16f   :  { %2236 = vmatpush1.bf16.msra.mxu0 %v2235_v48  ;;  %v658_v48 = vld [vmem:[#allocation7 + $0x11f8] sm:$0xff] }
 0x170   :  { %2238 = vmatprep.subr.bf16.mxu0 %v2237_v49  ;;  %v2613_v57 = vpop.f32.mrb[0].mxu1  ;;  %v2275_v49 = vpack.c.bf16 %v645_v45, %v639_v46  ;;  %v2277_v50 = vpack.c.bf16 %v658_v48, %v652_v47  ;;  %v661_v45 = vld [vmem:[#allocation8 + $0x8] sm:$0xff] }
 0x171   :  { %v2615_v60 = vpop.f32.mrb[1].mxu1  ;;  %v686_v48 = vrot.slane %v661_v45, %v2622_v56 }
 0x173   :  { %2240 = vmatpush1.bf16.msra.mxu0 %v2239_v54  ;;  %v2619_v54 = vsub.s32 0, %v2569_v61 }
 0x174   :  { %2242 = vmatprep.subr.bf16.mxu0 %v2241_v55  ;;  %v660_v55 = vld [vmem:[#allocation8] sm:$0xff] }
 0x175   :  { %v674_v41 = vrot.slane %v660_v55, %v2619_v54  ;;  %v678_v59 = vrot.slane %v660_v55, %v2622_v56  ;;  %v1410_v2 = vrot.slane %v660_v55, %v2626_v58  ;;  %v1550_v13 = vrot.slane %v660_v55, %v2643_v3 }
 0x176   :  { %v682_v47 = vrot.slane %v661_v45, %v2619_v54 }
 0x177   :  { %2244 = vmatpush1.bf16.msra.mxu0 %v2243_v62  ;;  %v2630_v62 = vsub.s32 5, %v2569_v61  ;;  %v1580_v20 = vrot.slane %v1550_v13, %v2643_v3 }
 0x178   :  { %2246 = vmatprep.subr.bf16.mxu0 %v2245_v63  ;;  %v704_v63 = vrot.slane %v674_v41, %v2619_v54  ;;  %v712_v51 = vrot.slane %v682_v47, %v2619_v54 }
 0x179   :  { %v1601_v33 = vmul.f32 %v1580_v20, %v2670_v27 }
 0x17a   :  { %v725_v7 = vmul.f32 %v704_v63, %v2636_v0 }
 0x17b   :  { %2248 = vmatpush1.bf16.msra.mxu0 %v2247_v4  ;;  %v708_v4 = vrot.slane %v678_v59, %v2619_v54  ;;  %v1558_v59 = vrot.slane %v661_v45, %v2643_v3 }
 0x17c   :  { %2250 = vmatprep.subr.bf16.mxu0 %v2249_v5  ;;  %v1414_v5 = vrot.slane %v660_v55, %v2630_v62 }
 0x17d   :  { %v726_v14 = vmul.f32 %v708_v4, %v2636_v0  ;;  %v727_v4 = vmul.f32 %v712_v51, %v2636_v0 }
 0x17e   :  { %v1444_v16 = vrot.slane %v1414_v5, %v2626_v58 }
 0x17f   :  { %2252 = vmatpush1.bf16.msra.mxu0 %v2251_v10  ;;  %v1484_v10 = vrot.slane %v660_v55, %v2639_v1  ;;  %v833_v21 = vadd.f32 %v2615_v60, %v726_v14 }
 0x180   :  { %2254 = vmatprep.subr.bf16.mxu0 %v2253_v12  ;;  %v1440_v12 = vrot.slane %v1410_v2, %v2626_v58  ;;  %v1562_v2 = vrot.slane %v661_v45, %v2648_v6 }
 0x182   :  { %v1461_v40 = vmul.f32 %v1440_v12, %v2658_v15  ;;  %v1588_v12 = vrot.slane %v1558_v59, %v2643_v3 }
 0x183   :  { %2256 = vmatpush1.bf16.msra.mxu0 %v2255_v17  ;;  %v831_v17 = vadd.f32 %v2613_v57, %v725_v7 }
 0x184   :  { %2258 = vmatprep.subr.bf16.mxu0 %v2257_v18 }
 0x187   :  { %2260 = vmatpush1.bf16.msra.mxu0 %v2259_v22 }
 0x188   :  { %2262 = vmatprep.subr.bf16.mxu0 %v2261_v23  ;;  %v1462_v23 = vmul.f32 %v1444_v16, %v2658_v15  ;;  %v1592_v16 = vrot.slane %v1562_v2, %v2643_v3 }
 0x18b   :  { %2264 = vmatpush1.bf16.msra.mxu0 %v2263_v30 }
 0x18c   :  { %2266 = vmatprep.subr.bf16.mxu0 %v2265_v31 }
 0x18f   :  { %2268 = vmatpush1.bf16.msra.mxu0 %v2267_v37 }
 0x190   :  { %2270 = vmatprep.subr.bf16.mxu0 %v2269_v38  ;;  %v1618_v38 = vrot.slane %v2674_v32, %v2619_v54 }
 0x193   :  { %2272 = vmatpush1.bf16.msra.mxu0 %v2271_v25 }
 0x194   :  { %2274 = vmatprep.subr.bf16.mxu0 %v2273_v44 }
 0x197   :  { %2276 = vmatpush1.bf16.msra.mxu0 %v2275_v49  ;;  %v1418_v49 = vrot.slane %v661_v45, %v2626_v58 }
 0x198   :  { %2278 = vmatprep.subr.bf16.mxu0 %v2277_v50  ;;  %v1422_v50 = vrot.slane %v661_v45, %v2630_v62 }
 0x199   :  { %v1448_v41 = vrot.slane %v1418_v49, %v2626_v58 }
 0x19a   :  { %v1452_v63 = vrot.slane %v1422_v50, %v2626_v58 }
 0x19b   :  { %2280 = vmatpush1.bf16.msra.mxu0 %v2279_v53  ;;  %v716_v53 = vrot.slane %v686_v48, %v2619_v54 }
 0x19c   :  { %v1464_v14 = vmul.f32 %v1452_v63, %v2658_v15 }
 0x19d   :  { %v728_v7 = vmul.f32 %v716_v53, %v2636_v0 }
 0x19e   :  { %1397 = vmatmul.mubr.f32.vlgmr.msra.gmra.mrb[2].mxu0 %v2608_v26  ;;  %v2634_v26 = vsub.s32 2, %v2569_v61  ;;  %v1554_v61 = vrot.slane %v660_v55, %v2648_v6 }
 0x1a0   :  { %v1480_v8 = vrot.slane %v660_v55, %v2634_v26  ;;  %v1514_v19 = vrot.slane %v1484_v10, %v2634_v26  ;;  %v1584_v24 = vrot.slane %v1554_v61, %v2643_v3  ;;  %v1488_v52 = vrot.slane %v661_v45, %v2634_v26 }
 0x1a1   :  { %v1492_v55 = vrot.slane %v661_v45, %v2639_v1  ;;  %v1463_v10 = vmul.f32 %v1448_v41, %v2658_v15 }
 0x1a2   :  { %v1510_v18 = vrot.slane %v1480_v8, %v2634_v26  ;;  %v1532_v31 = vmul.f32 %v1514_v19, %v2652_v9  ;;  %v1602_v36 = vmul.f32 %v1584_v24, %v2670_v27  ;;  %v1518_v5 = vrot.slane %v1488_v52, %v2634_v26 }
 0x1a3   :  { %v1522_v8 = vrot.slane %v1492_v55, %v2634_v26 }
 0x1a4   :  { %v1531_v57 = vmul.f32 %v1510_v18, %v2652_v9 }
 0x1b1   :  { %v972_v22 = vpop.f32.mrb[0].mxu0 }
 0x1b2   :  { %v2282_v28 = vadd.f32 %v972_v22, %v831_v17  ;;  %v974_v29 = vpop.f32.mrb[1].mxu0  ;;  %v1533_v17 = vmul.f32 %v1518_v5, %v2652_v9 }
 0x1b3   :  { %v2284_v30 = vadd.f32 %v974_v29, %v833_v21  ;;  %v1603_v21 = vmul.f32 %v1588_v12, %v2670_v27  ;;  %v1630_v29 = vrot.slane %v2674_v32, %v2643_v3 }
 0x1b4   :  { %v1467_v35 = vadd.f32 %v2282_v28, %v1461_v40  ;;  %v1534_v40 = vmul.f32 %v1522_v8, %v2652_v9  ;;  %v1626_v28 = vrot.slane %v2674_v32, %v2634_v26 }
 0x1b5   :  { %v1468_v60 = vadd.f32 %v2284_v30, %v1462_v23  ;;  %v1604_v23 = vmul.f32 %v1592_v16, %v2670_v27 }
 0x1b6   :  { %v1537_v37 = vadd.f32 %v1531_v57, %v1467_v35 }
 0x1b7   :  { %v1538_v39 = vadd.f32 %v1532_v31, %v1468_v60 }
 0x1b8   :  { %v1607_v43 = vadd.f32 %v1601_v33, %v1537_v37 }
 0x1b9   :  { %v1608_v34 = vadd.f32 %v1602_v36, %v1538_v39  ;;  %v662_v39 = vld [vmem:[#allocation8 + $0x10] sm:$0xff] }
 0x1ba   :  { %v1645_v25 = vadd.f32 %v1618_v38, %v1607_v43  ;;  %v694_v43 = vrot.slane %v662_v39, %v2622_v56  ;;  %v1496_v45 = vrot.slane %v662_v39, %v2634_v26  ;;  %v1566_v48 = vrot.slane %v662_v39, %v2643_v3 }
 0x1bb   :  { %v1646_v44 = vadd.f32 %v1622_v42, %v1608_v34  ;;  %v690_v42 = vrot.slane %v662_v39, %v2619_v54  ;;  %v1426_v34 = vrot.slane %v662_v39, %v2626_v58  ;;  %v1570_v50 = vrot.slane %v662_v39, %v2648_v6 }
 0x1bc   :  { %v724_v47 = vrot.slane %v694_v43, %v2619_v54  ;;  %v1526_v52 = vrot.slane %v1496_v45, %v2634_v26  ;;  %v1596_v59 = vrot.slane %v1566_v48, %v2643_v3 }
 0x1bd   :  { %v1657_v46 = vcombine.low %v1645_v25, %v1646_v44  ;;  %v1430_v25 = vrot.slane %v662_v39, %v2630_v62  ;;  %v720_v44 = vrot.slane %v690_v42, %v2619_v54  ;;  %v1600_v6 = vrot.slane %v1570_v50, %v2643_v3 }
 0x1be   :  { %v730_v55 = vmul.f32 %v724_v47, %v2636_v0  ;;  %v1535_v5 = vmul.f32 %v1526_v52, %v2652_v9 }
 0x1bf   :  { %v1665_v36 = vrot.slane %v1657_v46, %v2572_v11  ;;  %v1500_v46 = vrot.slane %v662_v39, %v2639_v1  ;;  %v1460_v49 = vrot.slane %v1430_v25, %v2626_v58  ;;  %v729_v51 = vmul.f32 %v720_v44, %v2636_v0 }
 0x1c1   :  { %v1530_v41 = vrot.slane %v1500_v46, %v2634_v26  ;;  %v1605_v26 = vmul.f32 %v1596_v59, %v2670_v27 }
 0x1c3   :  { %v1536_v8 = vmul.f32 %v1530_v41, %v2652_v9 }
 0x230   :  { %v1185_v13 = vpop.f32.mrb[2].mxu1 }
 0x231   :  { %v2285_v61 = vadd.f32 %v1185_v13, %v727_v4  ;;  %v1187_v18 = vpop.f32.mrb[3].mxu1  ;;  %v1606_v13 = vmul.f32 %v1600_v6, %v2670_v27 }
 0x232   :  { %v2286_v19 = vadd.f32 %v1187_v18, %v728_v7 }
 0x233   :  { %v1469_v20 = vadd.f32 %v2285_v61, %v1463_v10  ;;  %v1634_v10 = vrot.slane %v2674_v32, %v2622_v56 }
 0x234   :  { %v1470_v22 = vadd.f32 %v2286_v19, %v1464_v14 }
 0x235   :  { %v1539_v24 = vadd.f32 %v1533_v17, %v1469_v20 }
 0x236   :  { %v1540_v57 = vadd.f32 %v1534_v40, %v1470_v22 }
 0x237   :  { %v1609_v30 = vadd.f32 %v1603_v21, %v1539_v24 }
 0x238   :  { %v1610_v31 = vadd.f32 %v1604_v23, %v1540_v57 }
 0x239   :  { %v1647_v35 = vadd.f32 %v1626_v28, %v1609_v30 }
 0x23a   :  { %v1648_v33 = vadd.f32 %v1630_v29, %v1610_v31 }
 0x23c   :  { %v1658_v60 = vcombine.low %v1647_v35, %v1648_v33 }
 0x23e   :  { %v1672_v37 = vrot.slane %v1658_v60, %v2572_v11  ;;  %v1456_v11 = vrot.slane %v1426_v34, %v2626_v58  ;;  %v1466_v58 = vmul.f32 %v1460_v49, %v2658_v15 }
 0x240   :  { %v1673_v38 = vcombine.low %v1665_v36, %v1672_v37  ;;  %v1465_v1 = vmul.f32 %v1456_v11, %v2658_v15  ;;  %v1638_v15 = vrot.slane %v2674_v32, %v2630_v62 }
 0x242   :  { %1684 = vst [vmem:[#allocation11] sm:$0xff] %v1673_v38 }
 0x271   :  { %v1398_v53 = vpop.f32.mrb[2].mxu0 }
 0x272   :  { %v2287_v54 = vadd.f32 %v1398_v53, %v729_v51  ;;  %v1400_v63 = vpop.f32.mrb[3].mxu0 }
 0x273   :  { %v2288_v2 = vadd.f32 %v1400_v63, %v730_v55 }
 0x274   :  { %v1471_v4 = vadd.f32 %v2287_v54, %v1465_v1 }
 0x275   :  { %v1472_v7 = vadd.f32 %v2288_v2, %v1466_v58 }
 0x276   :  { %v1541_v0 = vadd.f32 %v1535_v5, %v1471_v4 }
 0x277   :  { %v1542_v12 = vadd.f32 %v1536_v8, %v1472_v7 }
 0x278   :  { %v1611_v14 = vadd.f32 %v1605_v26, %v1541_v0 }
 0x279   :  { %v1612_v3 = vadd.f32 %v1606_v13, %v1542_v12 }
 0x27a   :  { %v1649_v16 = vadd.f32 %v1634_v10, %v1611_v14 }
 0x27b   :  { %v1650_v61 = vadd.f32 %v1638_v15, %v1612_v3 }
 0x27d   :  { %v1674_v17 = vcombine.low %v1649_v16, %v1650_v61 }
 0x27f   :  { %1704 = vst.sshfl [vmem:[#allocation11 + $0x8] sm:$0x33 pattern:$0x76325410] %v1674_v17 }
 0x280   :  { %2440 = shalt.err (!%p2437_p2)
}
 0x281   :  { %s2441_s28 = scalar_lea.hbm %s2757_s5, 192 }
 0x282   :  { %p2442_p3 = scmp.ne.s32.totalorder %s2757_s5, %s2441_s28  ;;  %p2445_p4 = scmp.lt.u32.totalorder %s2441_s28, %s2757_s5 }
 0x284   :  { %p2447_p5 = pnand %p2445_p4, %p2442_p3 }
 0x286   :  { %2450 = shalt.err (!%p2447_p5)
}
 0x287   :  { %1695 = dma.vmem_to_hbm [thread:$0]  %s1693_s26, 192, %s2757_s5, [#allocation4]  }
 0x288   :  { %2457 = dma.done.wait [#allocation4], 192  }
 0x289   :  { %2458 = vsyncadd [#allocation4], 4294967104 }
 0x28a   :  { %1699 = vsyncpa [#allocation3], 1 }
 0x28b   :  { %1700 = vsyncpa [#allocation6], 1 }
 0x28c   :  { %1701 = vsyncpa [#allocation9], 1 }
 0x28d   :  { %1702 = vsyncpa [#allocation4], 1 }

</bundles_post_ra>
